<compile_context>
chip_gen: v7x
topology: tpu7x:2x2x1
jax: 0.10.0
libtpu: 0.0.40
codegen_flags: <defaults>
</compile_context>

<pallas_src>
import functools

import jax
import jax.numpy as jnp
from jax.experimental import pallas as pl
from jax.experimental.pallas import tpu as pltpu

LEAKY_SLOPE = 0.01  # torch.nn.LeakyReLU default negative_slope


def _leaky_relu(x):
    # max(x, a*x) == LeakyReLU_a(x) for 0 < a < 1.
    return jnp.maximum(x, LEAKY_SLOPE * x)


def _round_up(n, m):
    return ((n + m - 1) // m) * m


def _pick_batch_tile(batch):
    # Small batch: one grid step, rows rounded to the bf16 sublane-packing
    # minimum of 16.  Large batch: 512-row tiles for the 256-wide MXU.
    if batch <= 512:
        return max(16, _round_up(batch, 16))
    return 512


def final_decoder_kernel(x_ref, w1_ref, b1_ref, w2_ref, b2_ref, w3_ref, b3_ref,
                         o_ref):
    # Entire 3-layer MLP fused on one batch tile.  Matmul inputs are bf16, the
    # MXU accumulates in f32; bias-add + LeakyReLU run in f32 on the VPU, then
    # the activation is cast back to bf16 for the next matmul.
    x = x_ref[...]                                            # bf16 [tile, in_p]
    h = jnp.dot(x, w1_ref[...], preferred_element_type=jnp.float32)
    h = _leaky_relu(h + b1_ref[...]).astype(jnp.bfloat16)
    h = jnp.dot(h, w2_ref[...], preferred_element_type=jnp.float32)
    h = _leaky_relu(h + b2_ref[...]).astype(jnp.bfloat16)
    o = jnp.dot(h, w3_ref[...], preferred_element_type=jnp.float32)
    o_ref[...] = (o + b3_ref[...]).astype(o_ref.dtype)


def prepare_final_decoder_params(w1, b1, w2, b2, w3, b3):
    """One-time prep: cast weights to bf16 and pad to lane-dense shapes.

    Weights are [F_in, F_out]; biases are [F_out].  Returns (params, out_dim)
    where `params` is the tuple consumed by `final_decoder`.  Doing this once
    (instead of per call) removes ~4.3 MiB of redundant HBM traffic per call.
    """
    in_dim, hidden_dim = w1.shape
    out_dim = w3.shape[1]
    assert hidden_dim % 128 == 0, "hidden_dim must be a multiple of 128"

    in_p = _round_up(in_dim, 128)      # lane-dense K for the first matmul
    out_p = _round_up(out_dim, 128)    # lane-dense output stores (784 -> 896)

    bf16, f32 = jnp.bfloat16, jnp.float32
    params = (
        jnp.pad(w1.astype(bf16), ((0, in_p - in_dim), (0, 0))),          # W1
        b1.reshape(1, hidden_dim).astype(f32),                           # b1
        w2.astype(bf16),                                                 # W2
        b2.reshape(1, hidden_dim).astype(f32),                           # b2
        jnp.pad(w3.astype(bf16), ((0, 0), (0, out_p - out_dim))),        # W3
        jnp.pad(b3.reshape(1, out_dim).astype(f32),
                ((0, 0), (0, out_p - out_dim))),                         # b3
    )
    return params, out_dim


@functools.partial(jax.jit, static_argnames=("out_dim",))
def final_decoder(x, params, *, out_dim):
    """Fused MLP: leaky(x@W1+b1) -> leaky(.@W2+b2) -> .@W3+b3.

    `params` must come from prepare_final_decoder_params (pre-padded bf16).
    """
    w1_p, b1_p, w2_p, b2_p, w3_p, b3_p = params
    B, in_dim = x.shape
    in_p, hidden_dim = w1_p.shape
    out_p = w3_p.shape[1]

    tile = _pick_batch_tile(B)
    b_p = _round_up(B, tile)           # batch padded to a whole tile

    # Only the (small) activation is cast/padded per call; weights are already
    # resident in their kernel-ready layout.
    x_p = jnp.pad(x.astype(jnp.bfloat16), ((0, b_p - B), (0, in_p - in_dim)))

    full = lambda i: (0, 0)            # grid-invariant whole-matrix blocks

    out = pl.pallas_call(
        final_decoder_kernel,
        out_shape=jax.ShapeDtypeStruct((b_p, out_p), x.dtype),
        grid_spec=pltpu.PrefetchScalarGridSpec(
            num_scalar_prefetch=0,
            grid=(b_p // tile,),
            in_specs=[
                pl.BlockSpec((tile, in_p), lambda i: (i, 0)),   # x tile
                pl.BlockSpec((in_p, hidden_dim), full),         # W1
                pl.BlockSpec((1, hidden_dim), full),            # b1
                pl.BlockSpec((hidden_dim, hidden_dim), full),   # W2
                pl.BlockSpec((1, hidden_dim), full),            # b2
                pl.BlockSpec((hidden_dim, out_p), full),        # W3
                pl.BlockSpec((1, out_p), full),                 # b3
            ],
            out_specs=pl.BlockSpec((tile, out_p), lambda i: (i, 0)),
        ),
        compiler_params=pltpu.CompilerParams(
            dimension_semantics=("parallel",)),
    )(x_p, w1_p, b1_p, w2_p, b2_p, w3_p, b3_p)

    # Kept for PyTorch-signature parity; consumers that tolerate lane padding
    # should take the padded buffer directly and skip this extra copy.
    return out[:B, :out_dim]


def _reference(x, w1, b1, w2, b2, w3, b3):
    h = jnp.where(x @ w1 + b1 > 0, x @ w1 + b1, LEAKY_SLOPE * (x @ w1 + b1))
    h2 = h @ w2 + b2
    h2 = jnp.where(h2 > 0, h2, LEAKY_SLOPE * h2)
    return h2 @ w3 + b3


if __name__ == "__main__":
    # Module defaults: in_dim=64, out_dim=784, hidden_dim=512.
    in_dim, hidden_dim, out_dim = 64, 512, 784
    batch = 16

    key = jax.random.PRNGKey(0)
    kx, k1, k2, k3, kb1, kb2, kb3 = jax.random.split(key, 7)

    # Deterministic synthetic parameters (scaled like fan-in uniform init).
    x = jax.random.normal(kx, (batch, in_dim), dtype=jnp.float32)
    w1 = jax.random.uniform(k1, (in_dim, hidden_dim), jnp.float32,
                            -1.0, 1.0) / jnp.sqrt(in_dim)
    b1 = jax.random.uniform(kb1, (hidden_dim,), jnp.float32,
                            -1.0, 1.0) / jnp.sqrt(in_dim)
    w2 = jax.random.uniform(k2, (hidden_dim, hidden_dim), jnp.float32,
                            -1.0, 1.0) / jnp.sqrt(hidden_dim)
    b2 = jax.random.uniform(kb2, (hidden_dim,), jnp.float32,
                            -1.0, 1.0) / jnp.sqrt(hidden_dim)
    w3 = jax.random.uniform(k3, (hidden_dim, out_dim), jnp.float32,
                            -1.0, 1.0) / jnp.sqrt(hidden_dim)
    b3 = jax.random.uniform(kb3, (out_dim,), jnp.float32,
                            -1.0, 1.0) / jnp.sqrt(hidden_dim)

    # One-time weight prep (hoisted out of the per-call path).
    params, out_dim_static = prepare_final_decoder_params(w1, b1, w2, b2, w3, b3)
    params = jax.block_until_ready(params)

    out = final_decoder(x, params, out_dim=out_dim_static)
    out = jax.block_until_ready(out)

    ref = _reference(x, w1, b1.reshape(1, -1), w2, b2.reshape(1, -1),
                     w3, b3.reshape(1, -1))
    assert out.shape == (batch, out_dim), out.shape
    # bf16 matmul inputs with f32 accumulation -> slightly loose tolerance vs f32 ref.
    assert jnp.allclose(out, ref, atol=3e-2, rtol=3e-2), (
        float(jnp.max(jnp.abs(out - ref))))
    print("KERNEL_OK")
</pallas_src>

<mosaic_0001>
module attributes {stable_mosaic.version = 11 : i64} {
  func.func @final_decoder_kernel(%arg0: i32, %arg1: memref<16x128xbf16, #tpu.memory_space<vmem>>, %arg2: memref<128x512xbf16, #tpu.memory_space<vmem>>, %arg3: memref<1x512xf32, #tpu.memory_space<vmem>>, %arg4: memref<512x512xbf16, #tpu.memory_space<vmem>>, %arg5: memref<1x512xf32, #tpu.memory_space<vmem>>, %arg6: memref<512x896xbf16, #tpu.memory_space<vmem>>, %arg7: memref<1x896xf32, #tpu.memory_space<vmem>>, %arg8: memref<16x896xf32, #tpu.memory_space<vmem>>) attributes {dimension_semantics = [#tpu.dimension_semantics<parallel>], iteration_bounds = array<i64: 1>, scalar_prefetch = 0 : i64, scratch_operands = 0 : i64, tpu.core_type = #tpu.core_type<tc>, window_params = [{transform_indices = @transform_0, window_bounds = array<i64: 16, 128>}, {pipeline_mode = #tpu.pipeline_mode<synchronous>, transform_indices = @transform_1, window_bounds = array<i64: 128, 512>}, {pipeline_mode = #tpu.pipeline_mode<synchronous>, transform_indices = @transform_2, window_bounds = array<i64: 1, 512>}, {pipeline_mode = #tpu.pipeline_mode<synchronous>, transform_indices = @transform_3, window_bounds = array<i64: 512, 512>}, {pipeline_mode = #tpu.pipeline_mode<synchronous>, transform_indices = @transform_4, window_bounds = array<i64: 1, 512>}, {pipeline_mode = #tpu.pipeline_mode<synchronous>, transform_indices = @transform_5, window_bounds = array<i64: 512, 896>}, {pipeline_mode = #tpu.pipeline_mode<synchronous>, transform_indices = @transform_6, window_bounds = array<i64: 1, 896>}, {transform_indices = @transform_7, window_bounds = array<i64: 16, 896>}]} {
    %c0 = arith.constant 0 : index
    %c0_0 = arith.constant 0 : index
    %0 = vector.load %arg1[%c0, %c0_0] : memref<16x128xbf16, #tpu.memory_space<vmem>>, vector<16x128xbf16>
    %c0_1 = arith.constant 0 : index
    %c0_2 = arith.constant 0 : index
    %1 = vector.load %arg2[%c0_1, %c0_2] : memref<128x512xbf16, #tpu.memory_space<vmem>>, vector<128x512xbf16>
    %cst = arith.constant dense<0.000000e+00> : vector<16x512xf32>
    %2 = tpu.matmul %0, %1, %cst {dimension_numbers = #tpu.dot_dimension_numbers<[1], [0], [0], [1], [0, 0, 1, 1], [], []>} : vector<16x128xbf16>, vector<128x512xbf16>, vector<16x512xf32> -> vector<16x512xf32>
    %c0_3 = arith.constant 0 : index
    %c0_4 = arith.constant 0 : index
    %3 = vector.load %arg3[%c0_3, %c0_4] : memref<1x512xf32, #tpu.memory_space<vmem>>, vector<1x512xf32>
    %4 = vector.broadcast %3 : vector<1x512xf32> to vector<16x512xf32>
    %5 = arith.addf %2, %4 : vector<16x512xf32>
    %cst_5 = arith.constant 0.00999999977 : f32
    %6 = vector.broadcast %cst_5 : f32 to vector<16x512xf32>
    %7 = arith.mulf %6, %5 : vector<16x512xf32>
    %8 = arith.maximumf %5, %7 : vector<16x512xf32>
    %9 = arith.truncf %8 : vector<16x512xf32> to vector<16x512xbf16>
    %c0_6 = arith.constant 0 : index
    %c0_7 = arith.constant 0 : index
    %10 = vector.load %arg4[%c0_6, %c0_7] : memref<512x512xbf16, #tpu.memory_space<vmem>>, vector<512x512xbf16>
    %cst_8 = arith.constant dense<0.000000e+00> : vector<16x512xf32>
    %11 = tpu.matmul %9, %10, %cst_8 {dimension_numbers = #tpu.dot_dimension_numbers<[1], [0], [0], [1], [0, 0, 1, 1], [], []>} : vector<16x512xbf16>, vector<512x512xbf16>, vector<16x512xf32> -> vector<16x512xf32>
    %c0_9 = arith.constant 0 : index
    %c0_10 = arith.constant 0 : index
    %12 = vector.load %arg5[%c0_9, %c0_10] : memref<1x512xf32, #tpu.memory_space<vmem>>, vector<1x512xf32>
    %13 = vector.broadcast %12 : vector<1x512xf32> to vector<16x512xf32>
    %14 = arith.addf %11, %13 : vector<16x512xf32>
    %cst_11 = arith.constant 0.00999999977 : f32
    %15 = vector.broadcast %cst_11 : f32 to vector<16x512xf32>
    %16 = arith.mulf %15, %14 : vector<16x512xf32>
    %17 = arith.maximumf %14, %16 : vector<16x512xf32>
    %18 = arith.truncf %17 : vector<16x512xf32> to vector<16x512xbf16>
    %c0_12 = arith.constant 0 : index
    %c0_13 = arith.constant 0 : index
    %19 = vector.load %arg6[%c0_12, %c0_13] : memref<512x896xbf16, #tpu.memory_space<vmem>>, vector<512x896xbf16>
    %cst_14 = arith.constant dense<0.000000e+00> : vector<16x896xf32>
    %20 = tpu.matmul %18, %19, %cst_14 {dimension_numbers = #tpu.dot_dimension_numbers<[1], [0], [0], [1], [0, 0, 1, 1], [], []>} : vector<16x512xbf16>, vector<512x896xbf16>, vector<16x896xf32> -> vector<16x896xf32>
    %c0_15 = arith.constant 0 : index
    %c0_16 = arith.constant 0 : index
    %21 = vector.load %arg7[%c0_15, %c0_16] : memref<1x896xf32, #tpu.memory_space<vmem>>, vector<1x896xf32>
    %22 = vector.broadcast %21 : vector<1x896xf32> to vector<16x896xf32>
    %23 = arith.addf %20, %22 : vector<16x896xf32>
    %c0_17 = arith.constant 0 : index
    %c0_18 = arith.constant 0 : index
    %24 = vector.load %arg8[%c0_17, %c0_18] : memref<16x896xf32, #tpu.memory_space<vmem>>, vector<16x896xf32>
    tpu.vector_store %arg8[%c0_17, %c0_18], %23 {strides = array<i32>} : memref<16x896xf32, #tpu.memory_space<vmem>>, vector<16x896xf32>,
    return
  }
  func.func @transform_0(%arg0: i32) -> (i32, i32) {
    %c0_i32 = arith.constant 0 : i32
    %c0_i32_0 = arith.constant 0 : i32
    return %arg0, %c0_i32 : i32, i32
  }
  func.func @transform_1(%arg0: i32) -> (i32, i32) {
    %c0_i32 = arith.constant 0 : i32
    %c0_i32_0 = arith.constant 0 : i32
    %c0_i32_1 = arith.constant 0 : i32
    return %c0_i32, %c0_i32_0 : i32, i32
  }
  func.func @transform_2(%arg0: i32) -> (i32, i32) {
    %c0_i32 = arith.constant 0 : i32
    %c0_i32_0 = arith.constant 0 : i32
    %c0_i32_1 = arith.constant 0 : i32
    return %c0_i32, %c0_i32_0 : i32, i32
  }
  func.func @transform_3(%arg0: i32) -> (i32, i32) {
    %c0_i32 = arith.constant 0 : i32
    %c0_i32_0 = arith.constant 0 : i32
    %c0_i32_1 = arith.constant 0 : i32
    return %c0_i32, %c0_i32_0 : i32, i32
  }
  func.func @transform_4(%arg0: i32) -> (i32, i32) {
    %c0_i32 = arith.constant 0 : i32
    %c0_i32_0 = arith.constant 0 : i32
    %c0_i32_1 = arith.constant 0 : i32
    return %c0_i32, %c0_i32_0 : i32, i32
  }
  func.func @transform_5(%arg0: i32) -> (i32, i32) {
    %c0_i32 = arith.constant 0 : i32
    %c0_i32_0 = arith.constant 0 : i32
    %c0_i32_1 = arith.constant 0 : i32
    return %c0_i32, %c0_i32_0 : i32, i32
  }
  func.func @transform_6(%arg0: i32) -> (i32, i32) {
    %c0_i32 = arith.constant 0 : i32
    %c0_i32_0 = arith.constant 0 : i32
    %c0_i32_1 = arith.constant 0 : i32
    return %c0_i32, %c0_i32_0 : i32, i32
  }
  func.func @transform_7(%arg0: i32) -> (i32, i32) {
    %c0_i32 = arith.constant 0 : i32
    %c0_i32_0 = arith.constant 0 : i32
    return %arg0, %c0_i32 : i32, i32
  }
}

</mosaic_0001>

<bundles_post_ra>
// kernel: final_decoder.1
= control target key start
LH: loop header
LB: loop body
LE: loop exit
PB: predicated region body
PF: predicated region fallthrough
CT: control target
= control target key end

     0   :  { %12 = vsyncpa [#allocation3], 0  ;;  %s4516_s0 = inlined_call_operand.vmem [shape: bf16[16,128], index: 0, kind: input, shape index: {}]   ;;  %s4517_s1 = inlined_call_operand.hbm [shape: bf16[128,512], index: 1, kind: input, shape index: {}]   ;;  %s4518_s2 = inlined_call_operand.vmem [shape: f32[1,512], index: 2, kind: input, shape index: {}]   ;;  %s4519_s3 = inlined_call_operand.hbm [shape: bf16[512,512], index: 3, kind: input, shape index: {}]   ;;  %s4520_s4 = inlined_call_operand.vmem [shape: f32[1,512], index: 4, kind: input, shape index: {}]   ;;  %s4521_s5 = inlined_call_operand.hbm [shape: bf16[512,896], index: 5, kind: input, shape index: {}]   ;;  %s4522_s6 = inlined_call_operand.vmem [shape: f32[1,896], index: 6, kind: input, shape index: {}]   ;;  %s4523_s7 = inlined_call_operand.hbm [shape: f32[16,896], index: 7, kind: output, shape index: {}]  }
   0x1   :  { %13 = vsyncpa [#allocation6], 0 }
   0x2   :  { %14 = vsyncpa [#allocation4], 0  ;;  %s4331_s24 = smov [#allocation5]   ;;  %s4332_s26 = smov [#allocation2]  }
   0x3   :  { %s36_s25 = sshll.u32 %s4331_s24, 4  ;;  %s22_s27 = sshll.u32 %s4332_s26, 4  ;;  %s37_s25 = int_to_ptr.vmem [resolvable:$true] %s36_s25  ;;  %s4382_s27 = int_to_ptr.vmem [resolvable:$true] %s22_s27 }
   0x4   :  { %s4237_s30 = scalar_lea.hbm %s4519_s3, 16384 }
   0x5   :  { %p4238_p0 = scmp.ne.s32.totalorder %s4519_s3, %s4237_s30  ;;  %p4241_p1 = scmp.lt.u32.totalorder %s4237_s30, %s4519_s3 }
   0x7   :  { %p4243_p2 = pnand %p4241_p1, %p4238_p0 }
   0x9   :  { %4246 = shalt.err (!%p4243_p2)
}
   0xa   :  { %s4247_s12 = scalar_lea.vmem %s37_s25, 16384  ;;  %p4252_p4 = scmp.lt.s32.totalorder %s37_s25, %s37_s25 }
   0xb   :  { %p4248_p3 = scmp.ne.s32.totalorder %s37_s25, %s4247_s12  ;;  %p4253_p5 = scmp.lt.s32.totalorder %s4247_s12, %s4247_s12 }
   0xd   :  { %p4254_p6 = por %p4253_p5, %p4252_p4 }
   0xf   :  { %p4255_p7 = pnand %p4254_p6, %p4248_p3 }
  0x11   :  { %4258 = shalt.err (!%p4255_p7)
}
  0x12   :  { %s4333_s13 = smov 256   ;;  %s4334_s14 = smov 16  }
  0x13   :  { %42 = dma.hbm_to_vmem [thread:$0]  %s4519_s3, 16384, %s37_s25, [#allocation6], %s4333_s13, %s4333_s13, %s4334_s14  }
  0x14   :  { %s4259_s19 = scalar_lea.hbm %s4517_s1, 4096 }
  0x15   :  { %p4260_p8 = scmp.ne.s32.totalorder %s4517_s1, %s4259_s19  ;;  %p4263_p9 = scmp.lt.u32.totalorder %s4259_s19, %s4517_s1 }
  0x17   :  { %p4265_p10 = pnand %p4263_p9, %p4260_p8 }
  0x19   :  { %4268 = shalt.err (!%p4265_p10)
}
  0x1a   :  { %s4269_s24 = scalar_lea.vmem %s4382_s27, 4096  ;;  %p4274_p12 = scmp.lt.s32.totalorder %s4382_s27, %s4382_s27 }
  0x1b   :  { %p4270_p11 = scmp.ne.s32.totalorder %s4382_s27, %s4269_s24  ;;  %p4275_p13 = scmp.lt.s32.totalorder %s4269_s24, %s4269_s24 }
  0x1d   :  { %p4276_p0 = por %p4275_p13, %p4274_p12 }
  0x1f   :  { %p4277_p1 = pnand %p4276_p0, %p4270_p11 }
  0x21   :  { %4280 = shalt.err (!%p4277_p1)
}
  0x22   :  { %28 = dma.hbm_to_vmem [thread:$0]  %s4517_s1, 4096, %s4382_s27, [#allocation3], %s4333_s13, %s4333_s13, %s4334_s14  }
  0x23   :  { %s4335_s26 = smov [#allocation7]   ;;  %s4281_s8 = scalar_lea.hbm %s4521_s5, 28672 }
  0x24   :  { %s50_s28 = sshll.u32 %s4335_s26, 4  ;;  %p4282_p2 = scmp.ne.s32.totalorder %s4521_s5, %s4281_s8  ;;  %s51_s28 = int_to_ptr.vmem [resolvable:$true] %s50_s28 }
  0x25   :  { %p4285_p3 = scmp.lt.u32.totalorder %s4281_s8, %s4521_s5 }
  0x27   :  { %p4287_p4 = pnand %p4285_p3, %p4282_p2 }
  0x29   :  { %4290 = shalt.err (!%p4287_p4)
}
  0x2a   :  { %s4291_s15 = scalar_lea.vmem %s51_s28, 28672  ;;  %p4296_p6 = scmp.lt.s32.totalorder %s51_s28, %s51_s28 }
  0x2b   :  { %p4292_p5 = scmp.ne.s32.totalorder %s51_s28, %s4291_s15  ;;  %p4297_p7 = scmp.lt.s32.totalorder %s4291_s15, %s4291_s15 }
  0x2d   :  { %p4298_p8 = por %p4297_p7, %p4296_p6 }
  0x2f   :  { %p4299_p9 = pnand %p4298_p8, %p4292_p5 }
  0x31   :  { %4302 = shalt.err (!%p4299_p9)
}
  0x32   :  { %s4336_s1 = smov 448   ;;  %s4337_s27 = smov 28  }
  0x33   :  { %56 = dma.hbm_to_vmem [thread:$0]  %s4521_s5, 28672, %s51_s28, [#allocation6], %s4336_s1, %s4336_s1, %s4337_s27  }
  0x34   :  { %4325 = dma.done.wait [#allocation3], 4096  }
  0x35   :  { %4326 = vsyncadd [#allocation3], 4294963200 }
  0x36   :  { %4327 = dma.done.wait [#allocation6], 45056  }
  0x37   :  { %4328 = vsyncadd [#allocation6], 4294922240  ;;  %v4338_v0 = vmov 0   ;;  %v3676_v1 = vld [vmem:[#allocation2 + $0x4] ss:$16 sps:$4 sm:$0xff]  }
  0x38   :  { %323 = vmatprep.mubr.bf16.mxu1 %v4338_v0  ;;  %v3678_v2 = vld [vmem:[#allocation2] ss:$16 sps:$4 sm:$0xff]   ;;  %291 = vmatprep.subr.bf16.mxu1 %v3676_v1  ;;  %v3679_v3 = vld [vmem:[#allocation2 + $0x24] ss:$16 sps:$4 sm:$0xff]   ;;  %v3703_v20 = vld [vmem:[#allocation2 + $0xc] ss:$16 sps:$4 sm:$0xff]  }
  0x39   :  { %292 = vmatpush1.bf16.msra.mxu1 %v3678_v2  ;;  %v3681_v4 = vld [vmem:[#allocation2 + $0x20] ss:$16 sps:$4 sm:$0xff]   ;;  %v3682_v5 = vld [vmem:[#allocation2 + $0x44] ss:$16 sps:$4 sm:$0xff]   ;;  %v3701_v25 = vld [vmem:[#allocation2 + $0x8] ss:$16 sps:$4 sm:$0xff]  }
  0x3a   :  { %293 = vmatprep.subr.bf16.mxu1 %v3679_v3  ;;  %v3684_v6 = vld [vmem:[#allocation2 + $0x40] ss:$16 sps:$4 sm:$0xff]   ;;  %v3685_v7 = vld [vmem:[#allocation2 + $0x64] ss:$16 sps:$4 sm:$0xff]   ;;  %v3706_v26 = vld [vmem:[#allocation2 + $0x2c] ss:$16 sps:$4 sm:$0xff]  }
  0x3b   :  { %v3687_v8 = vld [vmem:[#allocation2 + $0x60] ss:$16 sps:$4 sm:$0xff]   ;;  %v3688_v9 = vld [vmem:[#allocation2 + $0x84] ss:$16 sps:$4 sm:$0xff]   ;;  %v3704_v29 = vld [vmem:[#allocation2 + $0x28] ss:$16 sps:$4 sm:$0xff]  }
  0x3c   :  { %v3690_v10 = vld [vmem:[#allocation2 + $0x80] ss:$16 sps:$4 sm:$0xff]   ;;  %v3691_v11 = vld [vmem:[#allocation2 + $0xa4] ss:$16 sps:$4 sm:$0xff]   ;;  %v3709_v31 = vld [vmem:[#allocation2 + $0x4c] ss:$16 sps:$4 sm:$0xff]  }
  0x3d   :  { %294 = vmatpush1.bf16.msra.mxu1 %v3681_v4  ;;  %v3693_v12 = vld [vmem:[#allocation2 + $0xa0] ss:$16 sps:$4 sm:$0xff]   ;;  %v3694_v13 = vld [vmem:[#allocation2 + $0xc4] ss:$16 sps:$4 sm:$0xff]   ;;  %v3707_v32 = vld [vmem:[#allocation2 + $0x48] ss:$16 sps:$4 sm:$0xff]  }
  0x3e   :  { %295 = vmatprep.subr.bf16.mxu1 %v3682_v5  ;;  %v3696_v14 = vld [vmem:[#allocation2 + $0xc0] ss:$16 sps:$4 sm:$0xff]   ;;  %v3725_v15 = vld [vmem:[#allocation5 + $0x4] ss:$16 sps:$4 sm:$0xff]   ;;  %v3712_v35 = vld [vmem:[#allocation2 + $0x6c] ss:$16 sps:$4 sm:$0xff]  }
  0x3f   :  { %v3697_v16 = vld [vmem:[#allocation2 + $0xe4] ss:$16 sps:$4 sm:$0xff]   ;;  %v3730_v17 = vld [vmem:[#allocation5] ss:$16 sps:$4 sm:$0xff]   ;;  %1187 = vmatprep.subr.bf16.mxu0 %v3725_v15  ;;  %v3710_v37 = vld [vmem:[#allocation2 + $0x68] ss:$16 sps:$4 sm:$0xff]  }
  0x40   :  { %v3731_v18 = vld [vmem:[#allocation5 + $0x24] ss:$16 sps:$4 sm:$0xff]   ;;  %v3699_v19 = vld [vmem:[#allocation2 + $0xe0] ss:$16 sps:$4 sm:$0xff]   ;;  %1188 = vmatpush1.bf16.msra.mxu0 %v3730_v17  ;;  %v3715_v39 = vld [vmem:[#allocation2 + $0x8c] ss:$16 sps:$4 sm:$0xff]  }
  0x41   :  { %296 = vmatpush1.bf16.msra.mxu1 %v3684_v6  ;;  %1189 = vmatprep.subr.bf16.mxu0 %v3731_v18  ;;  %v3736_v21 = vld [vmem:[#allocation5 + $0x20] ss:$16 sps:$4 sm:$0xff]   ;;  %v3737_v22 = vld [vmem:[#allocation5 + $0x44] ss:$16 sps:$4 sm:$0xff]   ;;  %v3713_v40 = vld [vmem:[#allocation2 + $0x88] ss:$16 sps:$4 sm:$0xff]  }
  0x42   :  { %297 = vmatprep.subr.bf16.mxu1 %v3685_v7  ;;  %v4428_v23 = vld [vmem:[%s4516_s0] sm:$0xff]   ;;  %v3718_v43 = vld [vmem:[#allocation2 + $0xac] ss:$16 sps:$4 sm:$0xff]   ;;  %v3716_v45 = vld [vmem:[#allocation2 + $0xa8] ss:$16 sps:$4 sm:$0xff]  }
  0x43   :  { %v3742_v24 = vld [vmem:[#allocation5 + $0x40] ss:$16 sps:$4 sm:$0xff]   ;;  %v3743_v27 = vld [vmem:[#allocation5 + $0x64] ss:$16 sps:$4 sm:$0xff]   ;;  %v3721_v47 = vld [vmem:[#allocation2 + $0xcc] ss:$16 sps:$4 sm:$0xff]  }
  0x44   :  { %1190 = vmatpush1.bf16.msra.mxu0 %v3736_v21  ;;  %v3748_v28 = vld [vmem:[#allocation5 + $0x60] ss:$16 sps:$4 sm:$0xff]   ;;  %v3749_v30 = vld [vmem:[#allocation5 + $0x84] ss:$16 sps:$4 sm:$0xff]   ;;  %v3719_v48 = vld [vmem:[#allocation2 + $0xc8] ss:$16 sps:$4 sm:$0xff]  }
  0x45   :  { %298 = vmatpush1.bf16.msra.mxu1 %v3687_v8  ;;  %1191 = vmatprep.subr.bf16.mxu0 %v3737_v22  ;;  %v3754_v33 = vld [vmem:[#allocation5 + $0x80] ss:$16 sps:$4 sm:$0xff]   ;;  %v3755_v34 = vld [vmem:[#allocation5 + $0xa4] ss:$16 sps:$4 sm:$0xff]   ;;  %v3724_v51 = vld [vmem:[#allocation2 + $0xec] ss:$16 sps:$4 sm:$0xff]  }
  0x46   :  { %299 = vmatprep.subr.bf16.mxu1 %v3688_v9  ;;  %v3760_v36 = vld [vmem:[#allocation5 + $0xa0] ss:$16 sps:$4 sm:$0xff]   ;;  %v3761_v38 = vld [vmem:[#allocation5 + $0xc4] ss:$16 sps:$4 sm:$0xff]   ;;  %v3722_v53 = vld [vmem:[#allocation2 + $0xe8] ss:$16 sps:$4 sm:$0xff]  }
  0x47   :  { %v3766_v41 = vld [vmem:[#allocation5 + $0xc0] ss:$16 sps:$4 sm:$0xff]   ;;  %v3767_v42 = vld [vmem:[#allocation5 + $0xe4] ss:$16 sps:$4 sm:$0xff]   ;;  %v3729_v55 = vld [vmem:[#allocation5 + $0xc] ss:$16 sps:$4 sm:$0xff]  }
  0x48   :  { %1192 = vmatpush1.bf16.msra.mxu0 %v3742_v24  ;;  %v3772_v44 = vld [vmem:[#allocation5 + $0xe0] ss:$16 sps:$4 sm:$0xff]   ;;  %v3773_v46 = vld [vmem:[#allocation5 + $0x104] ss:$16 sps:$4 sm:$0xff]   ;;  %v3727_v57 = vld [vmem:[#allocation5 + $0x8] ss:$16 sps:$4 sm:$0xff]  }
  0x49   :  { %300 = vmatpush1.bf16.msra.mxu1 %v3690_v10  ;;  %1193 = vmatprep.subr.bf16.mxu0 %v3743_v27  ;;  %v3778_v49 = vld [vmem:[#allocation5 + $0x100] ss:$16 sps:$4 sm:$0xff]   ;;  %v3779_v50 = vld [vmem:[#allocation5 + $0x124] ss:$16 sps:$4 sm:$0xff]   ;;  %v3735_v59 = vld [vmem:[#allocation5 + $0x2c] ss:$16 sps:$4 sm:$0xff]  }
  0x4a   :  { %301 = vmatprep.subr.bf16.mxu1 %v3691_v11  ;;  %v3784_v52 = vld [vmem:[#allocation5 + $0x120] ss:$16 sps:$4 sm:$0xff]   ;;  %v3785_v54 = vld [vmem:[#allocation5 + $0x144] ss:$16 sps:$4 sm:$0xff]   ;;  %v3733_v61 = vld [vmem:[#allocation5 + $0x28] ss:$16 sps:$4 sm:$0xff]  }
  0x4b   :  { %v3790_v56 = vld [vmem:[#allocation5 + $0x140] ss:$16 sps:$4 sm:$0xff]   ;;  %v3791_v58 = vld [vmem:[#allocation5 + $0x164] ss:$16 sps:$4 sm:$0xff]   ;;  %v3741_v63 = vld [vmem:[#allocation5 + $0x4c] ss:$16 sps:$4 sm:$0xff]  }
  0x4c   :  { %1194 = vmatpush1.bf16.msra.mxu0 %v3748_v28  ;;  %v3796_v60 = vld [vmem:[#allocation5 + $0x160] ss:$16 sps:$4 sm:$0xff]   ;;  %v3797_v62 = vld [vmem:[#allocation5 + $0x184] ss:$16 sps:$4 sm:$0xff]   ;;  %v3739_v1 = vld [vmem:[#allocation5 + $0x48] ss:$16 sps:$4 sm:$0xff]  }
  0x4d   :  { %302 = vmatpush1.bf16.msra.mxu1 %v3693_v12  ;;  %1195 = vmatprep.subr.bf16.mxu0 %v3749_v30  ;;  %v3747_v2 = vld [vmem:[#allocation5 + $0x6c] ss:$16 sps:$4 sm:$0xff]   ;;  %v3745_v3 = vld [vmem:[#allocation5 + $0x68] ss:$16 sps:$4 sm:$0xff]   ;;  %v3803_v22 = vld [vmem:[#allocation5 + $0x1a4] ss:$16 sps:$4 sm:$0xff]  }
  0x4e   :  { %303 = vmatprep.subr.bf16.mxu1 %v3694_v13  ;;  %v3753_v4 = vld [vmem:[#allocation5 + $0x8c] ss:$16 sps:$4 sm:$0xff]   ;;  %v3751_v5 = vld [vmem:[#allocation5 + $0x88] ss:$16 sps:$4 sm:$0xff]   ;;  %v3815_v30 = vld [vmem:[#allocation5 + $0x1e4] ss:$16 sps:$4 sm:$0xff]  }
  0x4f   :  { %v3759_v6 = vld [vmem:[#allocation5 + $0xac] ss:$16 sps:$4 sm:$0xff]   ;;  %v3757_v7 = vld [vmem:[#allocation5 + $0xa8] ss:$16 sps:$4 sm:$0xff]  }
  0x50   :  { %1196 = vmatpush1.bf16.msra.mxu0 %v3754_v33  ;;  %v3765_v8 = vld [vmem:[#allocation5 + $0xcc] ss:$16 sps:$4 sm:$0xff]   ;;  %v3763_v9 = vld [vmem:[#allocation5 + $0xc8] ss:$16 sps:$4 sm:$0xff]   ;;  %v3820_v33 = vld [vmem:[#allocation5 + $0x1e0] ss:$16 sps:$4 sm:$0xff]  }
  0x51   :  { %304 = vmatpush1.bf16.msra.mxu1 %v3696_v14  ;;  %1197 = vmatprep.subr.bf16.mxu0 %v3755_v34  ;;  %v3771_v10 = vld [vmem:[#allocation5 + $0xec] ss:$16 sps:$4 sm:$0xff]   ;;  %v3769_v11 = vld [vmem:[#allocation5 + $0xe8] ss:$16 sps:$4 sm:$0xff]   ;;  %v3823_v34 = vld [vmem:[#allocation5 + $0x204] ss:$16 sps:$4 sm:$0xff]  }
  0x52   :  { %305 = vmatprep.subr.bf16.mxu1 %v3697_v16  ;;  %v3777_v12 = vld [vmem:[#allocation5 + $0x10c] ss:$16 sps:$4 sm:$0xff]   ;;  %v3775_v13 = vld [vmem:[#allocation5 + $0x108] ss:$16 sps:$4 sm:$0xff]  }
  0x53   :  { %v3783_v14 = vld [vmem:[#allocation5 + $0x12c] ss:$16 sps:$4 sm:$0xff]   ;;  %v3781_v15 = vld [vmem:[#allocation5 + $0x128] ss:$16 sps:$4 sm:$0xff]  }
  0x54   :  { %1198 = vmatpush1.bf16.msra.mxu0 %v3760_v36  ;;  %v3789_v16 = vld [vmem:[#allocation5 + $0x14c] ss:$16 sps:$4 sm:$0xff]   ;;  %v3787_v17 = vld [vmem:[#allocation5 + $0x148] ss:$16 sps:$4 sm:$0xff]   ;;  %v105_v36 = vlaneseq }
  0x55   :  { %306 = vmatpush1.bf16.msra.mxu1 %v3699_v19  ;;  %1199 = vmatprep.subr.bf16.mxu0 %v3761_v38  ;;  %v3795_v18 = vld [vmem:[#allocation5 + $0x16c] ss:$16 sps:$4 sm:$0xff]   ;;  %v3793_v19 = vld [vmem:[#allocation5 + $0x168] ss:$16 sps:$4 sm:$0xff]  }
  0x56   :  { %334 = vmatprep.subr.bf16.mxu1 %v3703_v20  ;;  %v3801_v20 = vld [vmem:[#allocation5 + $0x18c] ss:$16 sps:$4 sm:$0xff]   ;;  %v3799_v21 = vld [vmem:[#allocation5 + $0x188] ss:$16 sps:$4 sm:$0xff]  }
  0x57   :  { %v3805_v24 = vld [vmem:[#allocation5 + $0x1a8] ss:$16 sps:$4 sm:$0xff]   ;;  %v3813_v27 = vld [vmem:[#allocation5 + $0x1cc] ss:$16 sps:$4 sm:$0xff]  }
  0x58   :  { %324 = vmatmul.mubr.bf16.vlgmr.msra.gmra.mrb[0].mxu1 %v4428_v23  ;;  %1200 = vmatpush1.bf16.msra.mxu0 %v3766_v41  ;;  %v3811_v28 = vld [vmem:[#allocation5 + $0x1c8] ss:$16 sps:$4 sm:$0xff]  }
  0x59   :  { %335 = vmatpush1.bf16.msra.mxu1 %v3701_v25  ;;  %366 = vmatprep.mubr.bf16.mxu1 %v4338_v0  ;;  %v3802_v0 = vld [vmem:[#allocation5 + $0x180] ss:$16 sps:$4 sm:$0xff]  }
  0x5a   :  { %336 = vmatprep.subr.bf16.mxu1 %v3706_v26  ;;  %1201 = vmatprep.subr.bf16.mxu0 %v3767_v42  ;;  %v3808_v25 = vld [vmem:[#allocation5 + $0x1a0] ss:$16 sps:$4 sm:$0xff]   ;;  %v3809_v26 = vld [vmem:[#allocation5 + $0x1c4] ss:$16 sps:$4 sm:$0xff]  }
  0x5c   :  { %1202 = vmatpush1.bf16.msra.mxu0 %v3772_v44 }
  0x5d   :  { %337 = vmatpush1.bf16.msra.mxu1 %v3704_v29  ;;  %1203 = vmatprep.subr.bf16.mxu0 %v3773_v46  ;;  %v3814_v29 = vld [vmem:[#allocation5 + $0x1c0] ss:$16 sps:$4 sm:$0xff]  }
  0x5e   :  { %338 = vmatprep.subr.bf16.mxu1 %v3709_v31  ;;  %v3819_v31 = vld [vmem:[#allocation5 + $0x1ec] ss:$16 sps:$4 sm:$0xff]  }
  0x60   :  { %1204 = vmatpush1.bf16.msra.mxu0 %v3778_v49 }
  0x61   :  { %339 = vmatpush1.bf16.msra.mxu1 %v3707_v32  ;;  %1205 = vmatprep.subr.bf16.mxu0 %v3779_v50  ;;  %v3817_v32 = vld [vmem:[#allocation5 + $0x1e8] ss:$16 sps:$4 sm:$0xff]  }
  0x62   :  { %340 = vmatprep.subr.bf16.mxu1 %v3712_v35  ;;  %v3826_v35 = vld [vmem:[#allocation5 + $0x20c] ss:$16 sps:$4 sm:$0xff]  }
  0x64   :  { %1206 = vmatpush1.bf16.msra.mxu0 %v3784_v52 }
  0x65   :  { %341 = vmatpush1.bf16.msra.mxu1 %v3710_v37  ;;  %1207 = vmatprep.subr.bf16.mxu0 %v3785_v54  ;;  %v4432_v37 = vshrl.u32 %v105_v36, 7 }
  0x66   :  { %342 = vmatprep.subr.bf16.mxu1 %v3715_v39  ;;  %v4440_v39 = vld [vmem:[%s4518_s2] sm:$0xf] }
  0x67   :  { %v4435_v38 = vsub.s32 0, %v4432_v37 }
  0x68   :  { %1208 = vmatpush1.bf16.msra.mxu0 %v3790_v56 }
  0x69   :  { %343 = vmatpush1.bf16.msra.mxu1 %v3713_v40  ;;  %1209 = vmatprep.subr.bf16.mxu0 %v3791_v58  ;;  %v4443_v40 = vsub.s32 1, %v4432_v37  ;;  %v108_v41 = vrot.slane %v4440_v39, %v4435_v38 }
  0x6a   :  { %344 = vmatprep.subr.bf16.mxu1 %v3718_v43 }
  0x6b   :  { %v112_v42 = vrot.slane %v4440_v39, %v4443_v40 }
  0x6c   :  { %1210 = vmatpush1.bf16.msra.mxu0 %v3796_v60 }
  0x6d   :  { %345 = vmatpush1.bf16.msra.mxu1 %v3716_v45  ;;  %1211 = vmatprep.subr.bf16.mxu0 %v3797_v62  ;;  %v3824_v62 = vld [vmem:[#allocation5 + $0x208] ss:$16 sps:$4 sm:$0xff]  }
  0x6e   :  { %346 = vmatprep.subr.bf16.mxu1 %v3721_v47 }
  0x70   :  { %1212 = vmatpush1.bf16.msra.mxu0 %v3802_v0  ;;  %v3832_v0 = vld [vmem:[#allocation5 + $0x22c] ss:$16 sps:$4 sm:$0xff]  }
  0x71   :  { %347 = vmatpush1.bf16.msra.mxu1 %v3719_v48  ;;  %1213 = vmatprep.subr.bf16.mxu0 %v3803_v22 }
  0x72   :  { %348 = vmatprep.subr.bf16.mxu1 %v3724_v51 }
  0x74   :  { %1214 = vmatpush1.bf16.msra.mxu0 %v3808_v25 }
  0x75   :  { %349 = vmatpush1.bf16.msra.mxu1 %v3722_v53  ;;  %1215 = vmatprep.subr.bf16.mxu0 %v3809_v26  ;;  %v3857_v26 = vld [vmem:[#allocation5 + $0x2c0] ss:$16 sps:$4 sm:$0xff]  }
  0x76   :  { %1273 = vmatprep.subr.bf16.mxu1 %v3729_v55 }
  0x78   :  { %367 = vmatmul.mubr.bf16.vlgmr.msra.gmra.mrb[4].mxu1 %v4428_v23  ;;  %v3807_v23 = vld [vmem:[#allocation5 + $0x1ac] ss:$16 sps:$4 sm:$0xff]   ;;  %1216 = vmatpush1.bf16.msra.mxu0 %v3814_v29  ;;  %v3860_v29 = vld [vmem:[#allocation5 + $0x2c8] ss:$16 sps:$4 sm:$0xff]  }
  0x79   :  { %1274 = vmatpush1.bf16.msra.mxu1 %v3727_v57  ;;  %1217 = vmatprep.subr.bf16.mxu0 %v3815_v30  ;;  %v3865_v30 = vld [vmem:[#allocation5 + $0x2e4] ss:$16 sps:$4 sm:$0xff]  }
  0x7a   :  { %1275 = vmatprep.subr.bf16.mxu1 %v3735_v59 }
  0x7c   :  { %1218 = vmatpush1.bf16.msra.mxu0 %v3820_v33  ;;  %v3868_v33 = vld [vmem:[#allocation5 + $0x2ec] ss:$16 sps:$4 sm:$0xff]  }
  0x7d   :  { %1276 = vmatpush1.bf16.msra.mxu1 %v3733_v61  ;;  %1230 = vmatprep.subr.bf16.mxu0 %v3823_v34  ;;  %v3821_v61 = vld [vmem:[#allocation5 + $0x200] ss:$16 sps:$4 sm:$0xff]  }
  0x7e   :  { %1277 = vmatprep.subr.bf16.mxu1 %v3741_v63  ;;  %v3829_v63 = vld [vmem:[#allocation5 + $0x224] ss:$16 sps:$4 sm:$0xff]  }
  0x81   :  { %1278 = vmatpush1.bf16.msra.mxu1 %v3739_v1  ;;  %v3827_v1 = vld [vmem:[#allocation5 + $0x220] ss:$16 sps:$4 sm:$0xff]  }
  0x82   :  { %1279 = vmatprep.subr.bf16.mxu1 %v3747_v2  ;;  %v3830_v2 = vld [vmem:[#allocation5 + $0x228] ss:$16 sps:$4 sm:$0xff]  }
  0x85   :  { %1280 = vmatpush1.bf16.msra.mxu1 %v3745_v3  ;;  %v3835_v3 = vld [vmem:[#allocation5 + $0x244] ss:$16 sps:$4 sm:$0xff]  }
  0x86   :  { %1281 = vmatprep.subr.bf16.mxu1 %v3753_v4  ;;  %v3838_v4 = vld [vmem:[#allocation5 + $0x24c] ss:$16 sps:$4 sm:$0xff]  }
  0x89   :  { %1282 = vmatpush1.bf16.msra.mxu1 %v3751_v5  ;;  %v3833_v5 = vld [vmem:[#allocation5 + $0x240] ss:$16 sps:$4 sm:$0xff]  }
  0x8a   :  { %1283 = vmatprep.subr.bf16.mxu1 %v3759_v6  ;;  %v3836_v6 = vld [vmem:[#allocation5 + $0x248] ss:$16 sps:$4 sm:$0xff]  }
  0x8d   :  { %1284 = vmatpush1.bf16.msra.mxu1 %v3757_v7  ;;  %v3841_v7 = vld [vmem:[#allocation5 + $0x264] ss:$16 sps:$4 sm:$0xff]  }
  0x8e   :  { %1285 = vmatprep.subr.bf16.mxu1 %v3765_v8  ;;  %v3844_v8 = vld [vmem:[#allocation5 + $0x26c] ss:$16 sps:$4 sm:$0xff]  }
  0x91   :  { %1286 = vmatpush1.bf16.msra.mxu1 %v3763_v9  ;;  %v3839_v9 = vld [vmem:[#allocation5 + $0x260] ss:$16 sps:$4 sm:$0xff]  }
  0x92   :  { %1287 = vmatprep.subr.bf16.mxu1 %v3771_v10  ;;  %v3842_v10 = vld [vmem:[#allocation5 + $0x268] ss:$16 sps:$4 sm:$0xff]  }
  0x95   :  { %1288 = vmatpush1.bf16.msra.mxu1 %v3769_v11  ;;  %v3847_v11 = vld [vmem:[#allocation5 + $0x284] ss:$16 sps:$4 sm:$0xff]  }
  0x96   :  { %1289 = vmatprep.subr.bf16.mxu1 %v3777_v12  ;;  %v3850_v12 = vld [vmem:[#allocation5 + $0x28c] ss:$16 sps:$4 sm:$0xff]  }
  0x99   :  { %1290 = vmatpush1.bf16.msra.mxu1 %v3775_v13  ;;  %v4450_v13 = vsub.s32 2, %v4432_v37 }
  0x9a   :  { %1291 = vmatprep.subr.bf16.mxu1 %v3783_v14  ;;  %v3845_v14 = vld [vmem:[#allocation5 + $0x280] ss:$16 sps:$4 sm:$0xff]  }
  0x9d   :  { %1292 = vmatpush1.bf16.msra.mxu1 %v3781_v15  ;;  %v3848_v15 = vld [vmem:[#allocation5 + $0x288] ss:$16 sps:$4 sm:$0xff]  }
  0x9e   :  { %1293 = vmatprep.subr.bf16.mxu1 %v3789_v16  ;;  %v4453_v16 = vsub.s32 3, %v4432_v37 }
  0xa0   :  { %v120_v22 = vrot.slane %v4440_v39, %v4453_v16 }
  0xa1   :  { %1294 = vmatpush1.bf16.msra.mxu1 %v3787_v17  ;;  %v3853_v17 = vld [vmem:[#allocation5 + $0x2a4] ss:$16 sps:$4 sm:$0xff]  }
  0xa2   :  { %1295 = vmatprep.subr.bf16.mxu1 %v3795_v18  ;;  %v3856_v18 = vld [vmem:[#allocation5 + $0x2ac] ss:$16 sps:$4 sm:$0xff]  }
  0xa5   :  { %1296 = vmatpush1.bf16.msra.mxu1 %v3793_v19  ;;  %v116_v19 = vrot.slane %v4440_v39, %v4450_v13 }
  0xa6   :  { %1297 = vmatprep.subr.bf16.mxu1 %v3801_v20  ;;  %v3851_v20 = vld [vmem:[#allocation5 + $0x2a0] ss:$16 sps:$4 sm:$0xff]  }
  0xa9   :  { %1298 = vmatpush1.bf16.msra.mxu1 %v3799_v21  ;;  %v3854_v21 = vld [vmem:[#allocation5 + $0x2a8] ss:$16 sps:$4 sm:$0xff]  }
  0xaa   :  { %1299 = vmatprep.subr.bf16.mxu1 %v3807_v23  ;;  %v3859_v23 = vld [vmem:[#allocation5 + $0x2c4] ss:$16 sps:$4 sm:$0xff]  }
  0xad   :  { %1300 = vmatpush1.bf16.msra.mxu1 %v3805_v24  ;;  %v3862_v24 = vld [vmem:[#allocation5 + $0x2cc] ss:$16 sps:$4 sm:$0xff]  }
  0xae   :  { %1301 = vmatprep.subr.bf16.mxu1 %v3813_v27 }
  0xb1   :  { %1302 = vmatpush1.bf16.msra.mxu1 %v3811_v28 }
  0xb2   :  { %1303 = vmatprep.subr.bf16.mxu1 %v3819_v31 }
  0xb5   :  { %1304 = vmatpush1.bf16.msra.mxu1 %v3817_v32 }
  0xb6   :  { %1316 = vmatprep.subr.bf16.mxu1 %v3826_v35 }
 0x12b   :  { %v325_v43 = vpop.f32.mrb[0].mxu1 }
 0x12c   :  { %v326_v44 = vadd.f32 %v325_v43, %v108_v41  ;;  %v327_v45 = vpop.f32.mrb[1].mxu1 }
 0x12d   :  { %v328_v46 = vadd.f32 %v327_v45, %v112_v42  ;;  %v329_v47 = vpop.f32.mrb[2].mxu1  ;;  %v3866_v45 = vld [vmem:[#allocation5 + $0x2e8] ss:$16 sps:$4 sm:$0xff]  }
 0x12e   :  { %v377_v48 = vmul.f32 0.01, %v326_v44  ;;  %v330_v49 = vadd.f32 %v329_v47, %v108_v41  ;;  %v331_v50 = vpop.f32.mrb[3].mxu1 }
 0x12f   :  { %v378_v51 = vmul.f32 0.01, %v328_v46  ;;  %v332_v52 = vadd.f32 %v331_v50, %v112_v42 }
 0x130   :  { %v381_v53 = vmul.f32 0.01, %v330_v49  ;;  %v385_v55 = vmax.f32 %v326_v44, %v377_v48  ;;  %v3863_v44 = vld [vmem:[#allocation5 + $0x2e0] ss:$16 sps:$4 sm:$0xff]   ;;  %v3871_v48 = vld [vmem:[#allocation5 + $0x304] ss:$16 sps:$4 sm:$0xff]  }
 0x131   :  { %v382_v54 = vmul.f32 0.01, %v332_v52  ;;  %v386_v57 = vmax.f32 %v328_v46, %v378_v51 }
 0x132   :  { %v389_v56 = vmax.f32 %v330_v49, %v381_v53  ;;  %v3874_v49 = vld [vmem:[#allocation5 + $0x30c] ss:$16 sps:$4 sm:$0xff]   ;;  %v3869_v53 = vld [vmem:[#allocation5 + $0x300] ss:$16 sps:$4 sm:$0xff]  }
 0x133   :  { %v390_v58 = vmax.f32 %v332_v52, %v382_v54  ;;  %v3872_v54 = vld [vmem:[#allocation5 + $0x308] ss:$16 sps:$4 sm:$0xff]  }
 0x134   :  { %v393_v59 = vpack.c.bf16 %v389_v56, %v385_v55  ;;  %v3877_v56 = vld [vmem:[#allocation5 + $0x324] ss:$16 sps:$4 sm:$0xff]  }
 0x135   :  { %v394_v60 = vpack.c.bf16 %v390_v58, %v386_v57  ;;  %v3880_v57 = vld [vmem:[#allocation5 + $0x32c] ss:$16 sps:$4 sm:$0xff]   ;;  %v3875_v58 = vld [vmem:[#allocation5 + $0x320] ss:$16 sps:$4 sm:$0xff]  }
 0x137   :  { %1219 = vmatprep.mubr.bf16.mxu0 %v394_v60  ;;  %1305 = vmatprep.mubr.bf16.mxu1 %v394_v60  ;;  %v3883_v60 = vld [vmem:[#allocation5 + $0x344] ss:$16 sps:$4 sm:$0xff]  }
 0x138   :  { %1220 = vmatmul.mubr.bf16.vlgmr.msra.gmra.mrb[0].mxu0 %v393_v59  ;;  %1306 = vmatmul.mubr.bf16.vlgmr.msra.gmra.mrb[8].mxu1 %v393_v59  ;;  %v3878_v59 = vld [vmem:[#allocation5 + $0x328] ss:$16 sps:$4 sm:$0xff]  }
 0x139   :  { %1231 = vmatpush1.bf16.msra.mxu0 %v3821_v61  ;;  %1317 = vmatpush1.bf16.msra.mxu1 %v3824_v62  ;;  %v3886_v61 = vld [vmem:[#allocation5 + $0x34c] ss:$16 sps:$4 sm:$0xff]   ;;  %v3881_v62 = vld [vmem:[#allocation5 + $0x340] ss:$16 sps:$4 sm:$0xff]  }
 0x13a   :  { %1232 = vmatprep.subr.bf16.mxu0 %v3829_v63  ;;  %1318 = vmatprep.subr.bf16.mxu1 %v3832_v0  ;;  %v3884_v63 = vld [vmem:[#allocation5 + $0x348] ss:$16 sps:$4 sm:$0xff]   ;;  %v3889_v0 = vld [vmem:[#allocation5 + $0x364] ss:$16 sps:$4 sm:$0xff]  }
 0x13d   :  { %1233 = vmatpush1.bf16.msra.mxu0 %v3827_v1  ;;  %1319 = vmatpush1.bf16.msra.mxu1 %v3830_v2  ;;  %v3892_v1 = vld [vmem:[#allocation5 + $0x36c] ss:$16 sps:$4 sm:$0xff]   ;;  %v3887_v2 = vld [vmem:[#allocation5 + $0x360] ss:$16 sps:$4 sm:$0xff]  }
 0x13e   :  { %1234 = vmatprep.subr.bf16.mxu0 %v3835_v3  ;;  %1320 = vmatprep.subr.bf16.mxu1 %v3838_v4  ;;  %v3890_v3 = vld [vmem:[#allocation5 + $0x368] ss:$16 sps:$4 sm:$0xff]   ;;  %v3895_v4 = vld [vmem:[#allocation5 + $0x384] ss:$16 sps:$4 sm:$0xff]  }
 0x141   :  { %1235 = vmatpush1.bf16.msra.mxu0 %v3833_v5  ;;  %1321 = vmatpush1.bf16.msra.mxu1 %v3836_v6  ;;  %v3898_v5 = vld [vmem:[#allocation5 + $0x38c] ss:$16 sps:$4 sm:$0xff]   ;;  %v3893_v6 = vld [vmem:[#allocation5 + $0x380] ss:$16 sps:$4 sm:$0xff]  }
 0x142   :  { %1236 = vmatprep.subr.bf16.mxu0 %v3841_v7  ;;  %1322 = vmatprep.subr.bf16.mxu1 %v3844_v8  ;;  %v3896_v7 = vld [vmem:[#allocation5 + $0x388] ss:$16 sps:$4 sm:$0xff]   ;;  %v3901_v8 = vld [vmem:[#allocation5 + $0x3a4] ss:$16 sps:$4 sm:$0xff]  }
 0x145   :  { %1237 = vmatpush1.bf16.msra.mxu0 %v3839_v9  ;;  %1323 = vmatpush1.bf16.msra.mxu1 %v3842_v10  ;;  %v3904_v9 = vld [vmem:[#allocation5 + $0x3ac] ss:$16 sps:$4 sm:$0xff]   ;;  %v3899_v10 = vld [vmem:[#allocation5 + $0x3a0] ss:$16 sps:$4 sm:$0xff]  }
 0x146   :  { %1238 = vmatprep.subr.bf16.mxu0 %v3847_v11  ;;  %1324 = vmatprep.subr.bf16.mxu1 %v3850_v12  ;;  %v3902_v11 = vld [vmem:[#allocation5 + $0x3a8] ss:$16 sps:$4 sm:$0xff]   ;;  %v3907_v12 = vld [vmem:[#allocation5 + $0x3c4] ss:$16 sps:$4 sm:$0xff]  }
 0x149   :  { %1239 = vmatpush1.bf16.msra.mxu0 %v3845_v14  ;;  %1325 = vmatpush1.bf16.msra.mxu1 %v3848_v15  ;;  %v3910_v14 = vld [vmem:[#allocation5 + $0x3cc] ss:$16 sps:$4 sm:$0xff]   ;;  %v3905_v15 = vld [vmem:[#allocation5 + $0x3c0] ss:$16 sps:$4 sm:$0xff]  }
 0x14a   :  { %1240 = vmatprep.subr.bf16.mxu0 %v3853_v17  ;;  %1326 = vmatprep.subr.bf16.mxu1 %v3856_v18  ;;  %v3908_v17 = vld [vmem:[#allocation5 + $0x3c8] ss:$16 sps:$4 sm:$0xff]   ;;  %v3913_v18 = vld [vmem:[#allocation5 + $0x3e4] ss:$16 sps:$4 sm:$0xff]  }
 0x14b   :  { %v368_v25 = vpop.f32.mrb[4].mxu1 }
 0x14c   :  { %v369_v27 = vadd.f32 %v368_v25, %v116_v19  ;;  %v370_v28 = vpop.f32.mrb[5].mxu1  ;;  %v3920_v25 = vld [vmem:[#allocation7 + $0x8] ss:$28 sps:$4 sm:$0xff]  }
 0x14d   :  { %1241 = vmatpush1.bf16.msra.mxu0 %v3851_v20  ;;  %1327 = vmatpush1.bf16.msra.mxu1 %v3854_v21  ;;  %v371_v31 = vadd.f32 %v370_v28, %v120_v22  ;;  %v372_v32 = vpop.f32.mrb[6].mxu1  ;;  %v3911_v20 = vld [vmem:[#allocation5 + $0x3e0] ss:$16 sps:$4 sm:$0xff]   ;;  %v3914_v21 = vld [vmem:[#allocation5 + $0x3e8] ss:$16 sps:$4 sm:$0xff]  }
 0x14e   :  { %1242 = vmatprep.subr.bf16.mxu0 %v3859_v23  ;;  %1328 = vmatprep.subr.bf16.mxu1 %v3862_v24  ;;  %v379_v34 = vmul.f32 0.01, %v369_v27  ;;  %v373_v35 = vadd.f32 %v372_v32, %v116_v19  ;;  %v374_v36 = vpop.f32.mrb[7].mxu1  ;;  %v3916_v19 = vld [vmem:[#allocation5 + $0x3ec] ss:$16 sps:$4 sm:$0xff]  }
 0x14f   :  { %v380_v39 = vmul.f32 0.01, %v371_v31  ;;  %v375_v41 = vadd.f32 %v374_v36, %v120_v22  ;;  %v3919_v22 = vld [vmem:[#allocation7 + $0x4] ss:$28 sps:$4 sm:$0xff]   ;;  %v3922_v23 = vld [vmem:[#allocation7 + $0xc] ss:$28 sps:$4 sm:$0xff]  }
 0x150   :  { %v387_v42 = vmax.f32 %v369_v27, %v379_v34  ;;  %v383_v43 = vmul.f32 0.01, %v373_v35  ;;  %v3917_v24 = vld [vmem:[#allocation7] ss:$28 sps:$4 sm:$0xff]   ;;  %v3923_v28 = vld [vmem:[#allocation7 + $0x38] ss:$28 sps:$4 sm:$0xff]  }
 0x151   :  { %1243 = vmatpush1.bf16.msra.mxu0 %v3857_v26  ;;  %1329 = vmatpush1.bf16.msra.mxu1 %v3860_v29  ;;  %v388_v46 = vmax.f32 %v371_v31, %v380_v39  ;;  %v384_v47 = vmul.f32 0.01, %v375_v41  ;;  %v3925_v26 = vld [vmem:[#allocation7 + $0x3c] ss:$28 sps:$4 sm:$0xff]   ;;  %v3928_v27 = vld [vmem:[#allocation7 + $0x44] ss:$28 sps:$4 sm:$0xff]  }
 0x152   :  { %1244 = vmatprep.subr.bf16.mxu0 %v3865_v30  ;;  %1330 = vmatprep.subr.bf16.mxu1 %v3868_v33  ;;  %v391_v50 = vmax.f32 %v373_v35, %v383_v43  ;;  %v3926_v29 = vld [vmem:[#allocation7 + $0x40] ss:$28 sps:$4 sm:$0xff]   ;;  %v3931_v30 = vld [vmem:[#allocation7 + $0x74] ss:$28 sps:$4 sm:$0xff]   ;;  %v3937_v34 = vld [vmem:[#allocation7 + $0xac] ss:$28 sps:$4 sm:$0xff]  }
 0x153   :  { %v392_v51 = vmax.f32 %v375_v41, %v384_v47  ;;  %v3934_v31 = vld [vmem:[#allocation7 + $0x7c] ss:$28 sps:$4 sm:$0xff]   ;;  %v3929_v32 = vld [vmem:[#allocation7 + $0x70] ss:$28 sps:$4 sm:$0xff]   ;;  %v3935_v36 = vld [vmem:[#allocation7 + $0xa8] ss:$28 sps:$4 sm:$0xff]  }
 0x154   :  { %v4459_v52 = vpack.c.bf16 %v391_v50, %v387_v42  ;;  %v3932_v33 = vld [vmem:[#allocation7 + $0x78] ss:$28 sps:$4 sm:$0xff]   ;;  %v3938_v39 = vld [vmem:[#allocation7 + $0xb0] ss:$28 sps:$4 sm:$0xff]   ;;  %v3943_v41 = vld [vmem:[#allocation7 + $0xe4] ss:$28 sps:$4 sm:$0xff]  }
 0x155   :  { %1245 = vmatpush1.bf16.msra.mxu0 %v3863_v44  ;;  %1331 = vmatpush1.bf16.msra.mxu1 %v3866_v45  ;;  %v396_v55 = vpack.c.bf16 %v392_v51, %v388_v46  ;;  %v3940_v35 = vld [vmem:[#allocation7 + $0xb4] ss:$28 sps:$4 sm:$0xff]   ;;  %v3946_v42 = vld [vmem:[#allocation7 + $0xec] ss:$28 sps:$4 sm:$0xff]   ;;  %v3941_v43 = vld [vmem:[#allocation7 + $0xe0] ss:$28 sps:$4 sm:$0xff]  }
 0x156   :  { %1246 = vmatprep.subr.bf16.mxu0 %v3871_v48  ;;  %1332 = vmatprep.subr.bf16.mxu1 %v3874_v49  ;;  %v3944_v44 = vld [vmem:[#allocation7 + $0xe8] ss:$28 sps:$4 sm:$0xff]   ;;  %v3949_v45 = vld [vmem:[#allocation7 + $0x11c] ss:$28 sps:$4 sm:$0xff]   ;;  %v3955_v49 = vld [vmem:[#allocation7 + $0x154] ss:$28 sps:$4 sm:$0xff]  }
 0x157   :  { %1262 = vmatprep.mubr.bf16.mxu0 %v396_v55  ;;  %1348 = vmatprep.mubr.bf16.mxu1 %v396_v55  ;;  %v3952_v46 = vld [vmem:[#allocation7 + $0x124] ss:$28 sps:$4 sm:$0xff]   ;;  %v3947_v47 = vld [vmem:[#allocation7 + $0x118] ss:$28 sps:$4 sm:$0xff]   ;;  %v3953_v51 = vld [vmem:[#allocation7 + $0x150] ss:$28 sps:$4 sm:$0xff]  }
 0x158   :  { %v3950_v48 = vld [vmem:[#allocation7 + $0x120] ss:$28 sps:$4 sm:$0xff]   ;;  %v3959_v55 = vld [vmem:[#allocation7 + $0x188] ss:$28 sps:$4 sm:$0xff]  }
 0x159   :  { %1247 = vmatpush1.bf16.msra.mxu0 %v3869_v53  ;;  %1333 = vmatpush1.bf16.msra.mxu1 %v3872_v54  ;;  %v3958_v50 = vld [vmem:[#allocation7 + $0x15c] ss:$28 sps:$4 sm:$0xff]   ;;  %v3961_v53 = vld [vmem:[#allocation7 + $0x18c] ss:$28 sps:$4 sm:$0xff]   ;;  %v3964_v54 = vld [vmem:[#allocation7 + $0x194] ss:$28 sps:$4 sm:$0xff]  }
 0x15a   :  { %1248 = vmatprep.subr.bf16.mxu0 %v3877_v56  ;;  %1334 = vmatprep.subr.bf16.mxu1 %v3880_v57  ;;  %v3962_v56 = vld [vmem:[#allocation7 + $0x190] ss:$28 sps:$4 sm:$0xff]   ;;  %v3967_v57 = vld [vmem:[#allocation7 + $0x1c4] ss:$28 sps:$4 sm:$0xff]  }
 0x15d   :  { %1249 = vmatpush1.bf16.msra.mxu0 %v3875_v58  ;;  %1335 = vmatpush1.bf16.msra.mxu1 %v3878_v59  ;;  %v3970_v58 = vld [vmem:[#allocation7 + $0x1cc] ss:$28 sps:$4 sm:$0xff]   ;;  %v3965_v59 = vld [vmem:[#allocation7 + $0x1c0] ss:$28 sps:$4 sm:$0xff]  }
 0x15e   :  { %1250 = vmatprep.subr.bf16.mxu0 %v3883_v60  ;;  %1336 = vmatprep.subr.bf16.mxu1 %v3886_v61  ;;  %v3968_v60 = vld [vmem:[#allocation7 + $0x1c8] ss:$28 sps:$4 sm:$0xff]   ;;  %v3973_v61 = vld [vmem:[#allocation7 + $0x1fc] ss:$28 sps:$4 sm:$0xff]  }
 0x161   :  { %1251 = vmatpush1.bf16.msra.mxu0 %v3881_v62  ;;  %1337 = vmatpush1.bf16.msra.mxu1 %v3884_v63  ;;  %v3976_v62 = vld [vmem:[#allocation7 + $0x204] ss:$28 sps:$4 sm:$0xff]   ;;  %v3971_v63 = vld [vmem:[#allocation7 + $0x1f8] ss:$28 sps:$4 sm:$0xff]  }
 0x162   :  { %1252 = vmatprep.subr.bf16.mxu0 %v3889_v0  ;;  %1338 = vmatprep.subr.bf16.mxu1 %v3892_v1  ;;  %v3974_v0 = vld [vmem:[#allocation7 + $0x200] ss:$28 sps:$4 sm:$0xff]   ;;  %v3979_v1 = vld [vmem:[#allocation7 + $0x234] ss:$28 sps:$4 sm:$0xff]  }
 0x165   :  { %1253 = vmatpush1.bf16.msra.mxu0 %v3887_v2  ;;  %1339 = vmatpush1.bf16.msra.mxu1 %v3890_v3  ;;  %v3982_v2 = vld [vmem:[#allocation7 + $0x23c] ss:$28 sps:$4 sm:$0xff]   ;;  %v3977_v3 = vld [vmem:[#allocation7 + $0x230] ss:$28 sps:$4 sm:$0xff]  }
 0x166   :  { %1254 = vmatprep.subr.bf16.mxu0 %v3895_v4  ;;  %1340 = vmatprep.subr.bf16.mxu1 %v3898_v5  ;;  %v3980_v4 = vld [vmem:[#allocation7 + $0x238] ss:$28 sps:$4 sm:$0xff]   ;;  %v3985_v5 = vld [vmem:[#allocation7 + $0x26c] ss:$28 sps:$4 sm:$0xff]  }
 0x169   :  { %1255 = vmatpush1.bf16.msra.mxu0 %v3893_v6  ;;  %1341 = vmatpush1.bf16.msra.mxu1 %v3896_v7  ;;  %v3988_v6 = vld [vmem:[#allocation7 + $0x274] ss:$28 sps:$4 sm:$0xff]   ;;  %v3983_v7 = vld [vmem:[#allocation7 + $0x268] ss:$28 sps:$4 sm:$0xff]  }
 0x16a   :  { %1256 = vmatprep.subr.bf16.mxu0 %v3901_v8  ;;  %1342 = vmatprep.subr.bf16.mxu1 %v3904_v9  ;;  %v3986_v8 = vld [vmem:[#allocation7 + $0x270] ss:$28 sps:$4 sm:$0xff]   ;;  %v3991_v9 = vld [vmem:[#allocation7 + $0x2a4] ss:$28 sps:$4 sm:$0xff]  }
 0x16d   :  { %1257 = vmatpush1.bf16.msra.mxu0 %v3899_v10  ;;  %1343 = vmatpush1.bf16.msra.mxu1 %v3902_v11  ;;  %v3994_v10 = vld [vmem:[#allocation7 + $0x2ac] ss:$28 sps:$4 sm:$0xff]   ;;  %v3989_v11 = vld [vmem:[#allocation7 + $0x2a0] ss:$28 sps:$4 sm:$0xff]  }
 0x16e   :  { %1258 = vmatprep.subr.bf16.mxu0 %v3907_v12  ;;  %1344 = vmatprep.subr.bf16.mxu1 %v3910_v14  ;;  %v3992_v12 = vld [vmem:[#allocation7 + $0x2a8] ss:$28 sps:$4 sm:$0xff]   ;;  %v3997_v14 = vld [vmem:[#allocation7 + $0x2dc] ss:$28 sps:$4 sm:$0xff]  }
 0x171   :  { %1259 = vmatpush1.bf16.msra.mxu0 %v3905_v15  ;;  %1345 = vmatpush1.bf16.msra.mxu1 %v3908_v17  ;;  %v4000_v15 = vld [vmem:[#allocation7 + $0x2e4] ss:$28 sps:$4 sm:$0xff]   ;;  %v3995_v17 = vld [vmem:[#allocation7 + $0x2d8] ss:$28 sps:$4 sm:$0xff]  }
 0x172   :  { %1260 = vmatprep.subr.bf16.mxu0 %v3913_v18  ;;  %1346 = vmatprep.subr.bf16.mxu1 %v3916_v19  ;;  %v3998_v18 = vld [vmem:[#allocation7 + $0x2e0] ss:$28 sps:$4 sm:$0xff]   ;;  %v4003_v19 = vld [vmem:[#allocation7 + $0x314] ss:$28 sps:$4 sm:$0xff]  }
 0x175   :  { %1261 = vmatpush1.bf16.msra.mxu0 %v3911_v20  ;;  %1347 = vmatpush1.bf16.msra.mxu1 %v3914_v21  ;;  %v4006_v20 = vld [vmem:[#allocation7 + $0x31c] ss:$28 sps:$4 sm:$0xff]   ;;  %v4001_v21 = vld [vmem:[#allocation7 + $0x310] ss:$28 sps:$4 sm:$0xff]  }
 0x176   :  { %2824 = vmatprep.subr.bf16.mxu0 %v3919_v22  ;;  %2910 = vmatprep.subr.bf16.mxu1 %v3922_v23  ;;  %v4004_v22 = vld [vmem:[#allocation7 + $0x318] ss:$28 sps:$4 sm:$0xff]   ;;  %v4009_v23 = vld [vmem:[#allocation7 + $0x34c] ss:$28 sps:$4 sm:$0xff]  }
 0x178   :  { %1263 = vmatmul.mubr.bf16.vlgmr.msra.gmra.mrb[0].mxu0 %v4459_v52  ;;  %1349 = vmatmul.mubr.bf16.vlgmr.msra.gmra.mrb[8].mxu1 %v4459_v52  ;;  %v3956_v52 = vld [vmem:[#allocation7 + $0x158] ss:$28 sps:$4 sm:$0xff]  }
 0x179   :  { %2825 = vmatpush1.bf16.msra.mxu0 %v3917_v24  ;;  %2911 = vmatpush1.bf16.msra.mxu1 %v3920_v25  ;;  %v4012_v24 = vld [vmem:[#allocation7 + $0x354] ss:$28 sps:$4 sm:$0xff]   ;;  %v4007_v25 = vld [vmem:[#allocation7 + $0x348] ss:$28 sps:$4 sm:$0xff]  }
 0x17a   :  { %2826 = vmatprep.subr.bf16.mxu0 %v3925_v26  ;;  %2912 = vmatprep.subr.bf16.mxu1 %v3928_v27  ;;  %v4010_v26 = vld [vmem:[#allocation7 + $0x350] ss:$28 sps:$4 sm:$0xff]   ;;  %v4015_v27 = vld [vmem:[#allocation7 + $0x384] ss:$28 sps:$4 sm:$0xff]  }
 0x17d   :  { %2827 = vmatpush1.bf16.msra.mxu0 %v3923_v28  ;;  %2913 = vmatpush1.bf16.msra.mxu1 %v3926_v29  ;;  %v4018_v28 = vld [vmem:[#allocation7 + $0x38c] ss:$28 sps:$4 sm:$0xff]   ;;  %v525_v29 = vld [vmem:[%s4520_s4] sm:$0xf] }
 0x17e   :  { %2828 = vmatprep.subr.bf16.mxu0 %v3931_v30  ;;  %2914 = vmatprep.subr.bf16.mxu1 %v3934_v31  ;;  %v530_v30 = vrot.slane %v525_v29, %v4435_v38  ;;  %v538_v31 = vrot.slane %v525_v29, %v4450_v13 }
 0x181   :  { %2829 = vmatpush1.bf16.msra.mxu0 %v3929_v32  ;;  %2915 = vmatpush1.bf16.msra.mxu1 %v3932_v33  ;;  %v534_v32 = vrot.slane %v525_v29, %v4443_v40  ;;  %v542_v33 = vrot.slane %v525_v29, %v4453_v16  ;;  %v4045_v29 = vld [vmem:[#allocation7 + $0x49c] ss:$28 sps:$4 sm:$0xff]  }
 0x182   :  { %2830 = vmatprep.subr.bf16.mxu0 %v3937_v34  ;;  %2916 = vmatprep.subr.bf16.mxu1 %v3940_v35 }
 0x185   :  { %2831 = vmatpush1.bf16.msra.mxu0 %v3935_v36  ;;  %2917 = vmatpush1.bf16.msra.mxu1 %v3938_v39 }
 0x186   :  { %2832 = vmatprep.subr.bf16.mxu0 %v3943_v41  ;;  %2918 = vmatprep.subr.bf16.mxu1 %v3946_v42 }
 0x189   :  { %2833 = vmatpush1.bf16.msra.mxu0 %v3941_v43  ;;  %2919 = vmatpush1.bf16.msra.mxu1 %v3944_v44 }
 0x18a   :  { %2834 = vmatprep.subr.bf16.mxu0 %v3949_v45  ;;  %2920 = vmatprep.subr.bf16.mxu1 %v3952_v46 }
 0x18d   :  { %2835 = vmatpush1.bf16.msra.mxu0 %v3947_v47  ;;  %2921 = vmatpush1.bf16.msra.mxu1 %v3950_v48 }
 0x18e   :  { %2836 = vmatprep.subr.bf16.mxu0 %v3955_v49  ;;  %2922 = vmatprep.subr.bf16.mxu1 %v3958_v50 }
 0x191   :  { %2837 = vmatpush1.bf16.msra.mxu0 %v3953_v51  ;;  %2923 = vmatpush1.bf16.msra.mxu1 %v3956_v52 }
 0x192   :  { %2838 = vmatprep.subr.bf16.mxu0 %v3961_v53  ;;  %2924 = vmatprep.subr.bf16.mxu1 %v3964_v54 }
 0x195   :  { %2839 = vmatpush1.bf16.msra.mxu0 %v3959_v55  ;;  %2925 = vmatpush1.bf16.msra.mxu1 %v3962_v56 }
 0x196   :  { %2840 = vmatprep.subr.bf16.mxu0 %v3967_v57  ;;  %2926 = vmatprep.subr.bf16.mxu1 %v3970_v58 }
 0x199   :  { %2841 = vmatpush1.bf16.msra.mxu0 %v3965_v59  ;;  %2927 = vmatpush1.bf16.msra.mxu1 %v3968_v60 }
 0x19a   :  { %2842 = vmatprep.subr.bf16.mxu0 %v3973_v61  ;;  %2928 = vmatprep.subr.bf16.mxu1 %v3976_v62 }
 0x19d   :  { %2843 = vmatpush1.bf16.msra.mxu0 %v3971_v63  ;;  %2929 = vmatpush1.bf16.msra.mxu1 %v3974_v0 }
 0x19e   :  { %2844 = vmatprep.subr.bf16.mxu0 %v3979_v1  ;;  %2930 = vmatprep.subr.bf16.mxu1 %v3982_v2 }
 0x1a1   :  { %2845 = vmatpush1.bf16.msra.mxu0 %v3977_v3  ;;  %2931 = vmatpush1.bf16.msra.mxu1 %v3980_v4 }
 0x1a2   :  { %2846 = vmatprep.subr.bf16.mxu0 %v3985_v5  ;;  %2932 = vmatprep.subr.bf16.mxu1 %v3988_v6 }
 0x1a5   :  { %2847 = vmatpush1.bf16.msra.mxu0 %v3983_v7  ;;  %2933 = vmatpush1.bf16.msra.mxu1 %v3986_v8 }
 0x1a6   :  { %2848 = vmatprep.subr.bf16.mxu0 %v3991_v9  ;;  %2934 = vmatprep.subr.bf16.mxu1 %v3994_v10  ;;  %v4013_v9 = vld [vmem:[#allocation7 + $0x380] ss:$28 sps:$4 sm:$0xff]   ;;  %v4016_v10 = vld [vmem:[#allocation7 + $0x388] ss:$28 sps:$4 sm:$0xff]  }
 0x1a9   :  { %2849 = vmatpush1.bf16.msra.mxu0 %v3989_v11  ;;  %2935 = vmatpush1.bf16.msra.mxu1 %v3992_v12  ;;  %v4021_v11 = vld [vmem:[#allocation7 + $0x3bc] ss:$28 sps:$4 sm:$0xff]   ;;  %v4024_v12 = vld [vmem:[#allocation7 + $0x3c4] ss:$28 sps:$4 sm:$0xff]  }
 0x1aa   :  { %2850 = vmatprep.subr.bf16.mxu0 %v3997_v14  ;;  %2936 = vmatprep.subr.bf16.mxu1 %v4000_v15  ;;  %v4019_v14 = vld [vmem:[#allocation7 + $0x3b8] ss:$28 sps:$4 sm:$0xff]   ;;  %v4022_v15 = vld [vmem:[#allocation7 + $0x3c0] ss:$28 sps:$4 sm:$0xff]  }
 0x1ad   :  { %2851 = vmatpush1.bf16.msra.mxu0 %v3995_v17  ;;  %2937 = vmatpush1.bf16.msra.mxu1 %v3998_v18  ;;  %v4027_v17 = vld [vmem:[#allocation7 + $0x3f4] ss:$28 sps:$4 sm:$0xff]   ;;  %v4030_v18 = vld [vmem:[#allocation7 + $0x3fc] ss:$28 sps:$4 sm:$0xff]  }
 0x1ae   :  { %2852 = vmatprep.subr.bf16.mxu0 %v4003_v19  ;;  %2938 = vmatprep.subr.bf16.mxu1 %v4006_v20  ;;  %v4025_v19 = vld [vmem:[#allocation7 + $0x3f0] ss:$28 sps:$4 sm:$0xff]   ;;  %v4028_v20 = vld [vmem:[#allocation7 + $0x3f8] ss:$28 sps:$4 sm:$0xff]  }
 0x1b1   :  { %2853 = vmatpush1.bf16.msra.mxu0 %v4001_v21  ;;  %2939 = vmatpush1.bf16.msra.mxu1 %v4004_v22  ;;  %v4033_v21 = vld [vmem:[#allocation7 + $0x42c] ss:$28 sps:$4 sm:$0xff]   ;;  %v4036_v22 = vld [vmem:[#allocation7 + $0x434] ss:$28 sps:$4 sm:$0xff]  }
 0x1b2   :  { %2854 = vmatprep.subr.bf16.mxu0 %v4009_v23  ;;  %2940 = vmatprep.subr.bf16.mxu1 %v4012_v24  ;;  %v4031_v23 = vld [vmem:[#allocation7 + $0x428] ss:$28 sps:$4 sm:$0xff]   ;;  %v4034_v24 = vld [vmem:[#allocation7 + $0x430] ss:$28 sps:$4 sm:$0xff]  }
 0x1b5   :  { %2855 = vmatpush1.bf16.msra.mxu0 %v4007_v25  ;;  %2941 = vmatpush1.bf16.msra.mxu1 %v4010_v26  ;;  %v4039_v25 = vld [vmem:[#allocation7 + $0x464] ss:$28 sps:$4 sm:$0xff]   ;;  %v4042_v26 = vld [vmem:[#allocation7 + $0x46c] ss:$28 sps:$4 sm:$0xff]  }
 0x1b6   :  { %2867 = vmatprep.subr.bf16.mxu0 %v4015_v27  ;;  %2953 = vmatprep.subr.bf16.mxu1 %v4018_v28  ;;  %v4037_v27 = vld [vmem:[#allocation7 + $0x460] ss:$28 sps:$4 sm:$0xff]   ;;  %v4040_v28 = vld [vmem:[#allocation7 + $0x468] ss:$28 sps:$4 sm:$0xff]  }
 0x24b   :  { %v1264_v34 = vpop.f32.mrb[0].mxu0  ;;  %v1350_v35 = vpop.f32.mrb[8].mxu1 }
 0x24c   :  { %v3625_v36 = vadd.f32 %v1264_v34, %v530_v30  ;;  %v3629_v39 = vadd.f32 %v1350_v35, %v538_v31  ;;  %v1266_v41 = vpop.f32.mrb[1].mxu0  ;;  %v1352_v42 = vpop.f32.mrb[9].mxu1  ;;  %v4054_v34 = vld [vmem:[#allocation7 + $0x4dc] ss:$28 sps:$4 sm:$0xff]   ;;  %v4049_v35 = vld [vmem:[#allocation7 + $0x4d0] ss:$28 sps:$4 sm:$0xff]  }
 0x24d   :  { %v3626_v43 = vadd.f32 %v1266_v41, %v534_v32  ;;  %v3630_v44 = vadd.f32 %v1352_v42, %v542_v33  ;;  %v1268_v45 = vpop.f32.mrb[2].mxu0  ;;  %v1354_v46 = vpop.f32.mrb[10].mxu1  ;;  %v4060_v41 = vld [vmem:[#allocation7 + $0x514] ss:$28 sps:$4 sm:$0xff]   ;;  %v4055_v42 = vld [vmem:[#allocation7 + $0x508] ss:$28 sps:$4 sm:$0xff]  }
 0x24e   :  { %v1359_v47 = vmul.f32 0.01, %v3625_v36  ;;  %v1361_v48 = vmul.f32 0.01, %v3629_v39  ;;  %v3627_v49 = vadd.f32 %v1268_v45, %v530_v30  ;;  %v3631_v50 = vadd.f32 %v1354_v46, %v538_v31  ;;  %v1270_v51 = vpop.f32.mrb[3].mxu0  ;;  %v1356_v52 = vpop.f32.mrb[11].mxu1 }
 0x24f   :  { %v1360_v53 = vmul.f32 0.01, %v3626_v43  ;;  %v1362_v54 = vmul.f32 0.01, %v3630_v44  ;;  %v3628_v55 = vadd.f32 %v1270_v51, %v534_v32  ;;  %v3632_v56 = vadd.f32 %v1356_v52, %v542_v33  ;;  %v4048_v30 = vld [vmem:[#allocation7 + $0x4a4] ss:$28 sps:$4 sm:$0xff]  }
 0x250   :  { %v1363_v57 = vmul.f32 0.01, %v3627_v49  ;;  %v1365_v58 = vmul.f32 0.01, %v3631_v50  ;;  %v1367_v61 = vmax.f32 %v3625_v36, %v1359_v47  ;;  %v1369_v62 = vmax.f32 %v3629_v39, %v1361_v48  ;;  %v4043_v31 = vld [vmem:[#allocation7 + $0x498] ss:$28 sps:$4 sm:$0xff]  }
 0x251   :  { %v1364_v59 = vmul.f32 0.01, %v3628_v55  ;;  %v1366_v60 = vmul.f32 0.01, %v3632_v56  ;;  %v1368_v1 = vmax.f32 %v3626_v43, %v1360_v53  ;;  %v1370_v2 = vmax.f32 %v3630_v44, %v1362_v54  ;;  %v4046_v32 = vld [vmem:[#allocation7 + $0x4a0] ss:$28 sps:$4 sm:$0xff]  }
 0x252   :  { %v1371_v63 = vmax.f32 %v3627_v49, %v1363_v57  ;;  %v1373_v0 = vmax.f32 %v3631_v50, %v1365_v58  ;;  %v4051_v33 = vld [vmem:[#allocation7 + $0x4d4] ss:$28 sps:$4 sm:$0xff]   ;;  %v4057_v39 = vld [vmem:[#allocation7 + $0x50c] ss:$28 sps:$4 sm:$0xff]   ;;  %v4063_v44 = vld [vmem:[#allocation7 + $0x544] ss:$28 sps:$4 sm:$0xff]  }
 0x253   :  { %v1372_v3 = vmax.f32 %v3628_v55, %v1364_v59  ;;  %v1374_v4 = vmax.f32 %v3632_v56, %v1366_v60  ;;  %v4052_v36 = vld [vmem:[#allocation7 + $0x4d8] ss:$28 sps:$4 sm:$0xff]   ;;  %v4058_v43 = vld [vmem:[#allocation7 + $0x510] ss:$28 sps:$4 sm:$0xff]   ;;  %v4061_v46 = vld [vmem:[#allocation7 + $0x540] ss:$28 sps:$4 sm:$0xff]  }
 0x254   :  { %v4470_v5 = vpack.c.bf16 %v1371_v63, %v1367_v61  ;;  %v4472_v6 = vpack.c.bf16 %v1373_v0, %v1369_v62  ;;  %v4066_v45 = vld [vmem:[#allocation7 + $0x54c] ss:$28 sps:$4 sm:$0xff]   ;;  %v4069_v48 = vld [vmem:[#allocation7 + $0x57c] ss:$28 sps:$4 sm:$0xff]   ;;  %v4072_v49 = vld [vmem:[#allocation7 + $0x584] ss:$28 sps:$4 sm:$0xff]  }
 0x255   :  { %v4474_v7 = vpack.c.bf16 %v1372_v3, %v1368_v1  ;;  %v4476_v8 = vpack.c.bf16 %v1374_v4, %v1370_v2  ;;  %v4064_v47 = vld [vmem:[#allocation7 + $0x548] ss:$28 sps:$4 sm:$0xff]   ;;  %v4067_v50 = vld [vmem:[#allocation7 + $0x578] ss:$28 sps:$4 sm:$0xff]   ;;  %v4070_v51 = vld [vmem:[#allocation7 + $0x580] ss:$28 sps:$4 sm:$0xff]  }
 0x256   :  { %v4075_v52 = vld [vmem:[#allocation7 + $0x5b4] ss:$28 sps:$4 sm:$0xff]   ;;  %v4078_v53 = vld [vmem:[#allocation7 + $0x5bc] ss:$28 sps:$4 sm:$0xff]   ;;  %v4081_v56 = vld [vmem:[#allocation7 + $0x5ec] ss:$28 sps:$4 sm:$0xff]  }
 0x257   :  { %2856 = vmatprep.mubr.bf16.mxu0 %v4474_v7  ;;  %2942 = vmatprep.mubr.bf16.mxu1 %v4474_v7  ;;  %v4073_v54 = vld [vmem:[#allocation7 + $0x5b0] ss:$28 sps:$4 sm:$0xff]   ;;  %v4076_v55 = vld [vmem:[#allocation7 + $0x5b8] ss:$28 sps:$4 sm:$0xff]   ;;  %v4079_v58 = vld [vmem:[#allocation7 + $0x5e8] ss:$28 sps:$4 sm:$0xff]  }
 0x258   :  { %2857 = vmatmul.mubr.bf16.vlgmr.msra.gmra.mrb[4].mxu0 %v4470_v5  ;;  %2943 = vmatmul.mubr.bf16.vlgmr.msra.gmra.mrb[12].mxu1 %v4470_v5  ;;  %v4084_v57 = vld [vmem:[#allocation7 + $0x5f4] ss:$28 sps:$4 sm:$0xff]   ;;  %v4087_v60 = vld [vmem:[#allocation7 + $0x624] ss:$28 sps:$4 sm:$0xff]   ;;  %v4090_v61 = vld [vmem:[#allocation7 + $0x62c] ss:$28 sps:$4 sm:$0xff]  }
 0x259   :  { %2868 = vmatpush1.bf16.msra.mxu0 %v4013_v9  ;;  %2954 = vmatpush1.bf16.msra.mxu1 %v4016_v10  ;;  %v4082_v59 = vld [vmem:[#allocation7 + $0x5f0] ss:$28 sps:$4 sm:$0xff]   ;;  %v4085_v62 = vld [vmem:[#allocation7 + $0x620] ss:$28 sps:$4 sm:$0xff]   ;;  %v4088_v63 = vld [vmem:[#allocation7 + $0x628] ss:$28 sps:$4 sm:$0xff]  }
 0x25a   :  { %2899 = vmatprep.mubr.bf16.mxu0 %v4476_v8  ;;  %2985 = vmatprep.mubr.bf16.mxu1 %v4476_v8  ;;  %v4093_v0 = vld [vmem:[#allocation7 + $0x65c] ss:$28 sps:$4 sm:$0xff]   ;;  %v4096_v1 = vld [vmem:[#allocation7 + $0x664] ss:$28 sps:$4 sm:$0xff]   ;;  %v4099_v4 = vld [vmem:[#allocation7 + $0x694] ss:$28 sps:$4 sm:$0xff]  }
 0x25b   :  { %2869 = vmatprep.subr.bf16.mxu0 %v4021_v11  ;;  %2955 = vmatprep.subr.bf16.mxu1 %v4024_v12  ;;  %v4091_v2 = vld [vmem:[#allocation7 + $0x658] ss:$28 sps:$4 sm:$0xff]   ;;  %v4094_v3 = vld [vmem:[#allocation7 + $0x660] ss:$28 sps:$4 sm:$0xff]   ;;  %v4097_v10 = vld [vmem:[#allocation7 + $0x690] ss:$28 sps:$4 sm:$0xff]  }
 0x25c   :  { %v4102_v9 = vld [vmem:[#allocation7 + $0x69c] ss:$28 sps:$4 sm:$0xff]   ;;  %v4105_v12 = vld [vmem:[#allocation7 + $0x6cc] ss:$28 sps:$4 sm:$0xff]  }
 0x25d   :  { %2870 = vmatpush1.bf16.msra.mxu0 %v4019_v14  ;;  %2956 = vmatpush1.bf16.msra.mxu1 %v4022_v15  ;;  %v4100_v11 = vld [vmem:[#allocation7 + $0x698] ss:$28 sps:$4 sm:$0xff]   ;;  %v4103_v15 = vld [vmem:[#allocation7 + $0x6c8] ss:$28 sps:$4 sm:$0xff]  }
 0x25e   :  { %2871 = vmatprep.subr.bf16.mxu0 %v4027_v17  ;;  %2957 = vmatprep.subr.bf16.mxu1 %v4030_v18  ;;  %v4108_v14 = vld [vmem:[#allocation7 + $0x6d4] ss:$28 sps:$4 sm:$0xff]  }
 0x25f   :  { %v4106_v17 = vld [vmem:[#allocation7 + $0x6d0] ss:$28 sps:$4 sm:$0xff]  }
 0x260   :  { %v4111_v18 = vld [vmem:[#allocation7 + $0x14] ss:$28 sps:$4 sm:$0xff]  }
 0x261   :  { %2872 = vmatpush1.bf16.msra.mxu0 %v4025_v19  ;;  %2958 = vmatpush1.bf16.msra.mxu1 %v4028_v20  ;;  %v4112_v19 = vld [vmem:[#allocation7 + $0x1d8] ss:$28 sps:$4 sm:$0xff]   ;;  %v4109_v20 = vld [vmem:[#allocation7 + $0x10] ss:$28 sps:$4 sm:$0xff]  }
 0x262   :  { %2873 = vmatprep.subr.bf16.mxu0 %v4033_v21  ;;  %2959 = vmatprep.subr.bf16.mxu1 %v4036_v22  ;;  %v4113_v21 = vld [vmem:[#allocation7 + $0x18] ss:$28 sps:$4 sm:$0xff]   ;;  %v4116_v22 = vld [vmem:[#allocation7 + $0x4c] ss:$28 sps:$4 sm:$0xff]  }
 0x265   :  { %2874 = vmatpush1.bf16.msra.mxu0 %v4031_v23  ;;  %2960 = vmatpush1.bf16.msra.mxu1 %v4034_v24  ;;  %v4117_v23 = vld [vmem:[#allocation7 + $0x210] ss:$28 sps:$4 sm:$0xff]   ;;  %v4114_v24 = vld [vmem:[#allocation7 + $0x48] ss:$28 sps:$4 sm:$0xff]  }
 0x266   :  { %2875 = vmatprep.subr.bf16.mxu0 %v4039_v25  ;;  %2961 = vmatprep.subr.bf16.mxu1 %v4042_v26  ;;  %v4118_v25 = vld [vmem:[#allocation7 + $0x50] ss:$28 sps:$4 sm:$0xff]   ;;  %v4121_v26 = vld [vmem:[#allocation7 + $0x84] ss:$28 sps:$4 sm:$0xff]  }
 0x269   :  { %2876 = vmatpush1.bf16.msra.mxu0 %v4037_v27  ;;  %2962 = vmatpush1.bf16.msra.mxu1 %v4040_v28  ;;  %v4122_v27 = vld [vmem:[#allocation7 + $0x248] ss:$28 sps:$4 sm:$0xff]   ;;  %v4119_v28 = vld [vmem:[#allocation7 + $0x80] ss:$28 sps:$4 sm:$0xff]  }
 0x26a   :  { %2877 = vmatprep.subr.bf16.mxu0 %v4045_v29  ;;  %2963 = vmatprep.subr.bf16.mxu1 %v4048_v30  ;;  %v4123_v29 = vld [vmem:[#allocation7 + $0x88] ss:$28 sps:$4 sm:$0xff]   ;;  %v4126_v30 = vld [vmem:[#allocation7 + $0xbc] ss:$28 sps:$4 sm:$0xff]  }
 0x26d   :  { %2878 = vmatpush1.bf16.msra.mxu0 %v4043_v31  ;;  %2964 = vmatpush1.bf16.msra.mxu1 %v4046_v32  ;;  %v4127_v31 = vld [vmem:[#allocation7 + $0x280] ss:$28 sps:$4 sm:$0xff]   ;;  %v4124_v32 = vld [vmem:[#allocation7 + $0xb8] ss:$28 sps:$4 sm:$0xff]  }
 0x26e   :  { %2879 = vmatprep.subr.bf16.mxu0 %v4051_v33  ;;  %2965 = vmatprep.subr.bf16.mxu1 %v4054_v34  ;;  %v4128_v33 = vld [vmem:[#allocation7 + $0xc0] ss:$28 sps:$4 sm:$0xff]   ;;  %v4131_v34 = vld [vmem:[#allocation7 + $0xf4] ss:$28 sps:$4 sm:$0xff]  }
 0x271   :  { %2880 = vmatpush1.bf16.msra.mxu0 %v4049_v35  ;;  %2966 = vmatpush1.bf16.msra.mxu1 %v4052_v36  ;;  %v4129_v35 = vld [vmem:[#allocation7 + $0xf0] ss:$28 sps:$4 sm:$0xff]   ;;  %v4133_v36 = vld [vmem:[#allocation7 + $0xf8] ss:$28 sps:$4 sm:$0xff]  }
 0x272   :  { %2881 = vmatprep.subr.bf16.mxu0 %v4057_v39  ;;  %2967 = vmatprep.subr.bf16.mxu1 %v4060_v41  ;;  %v4136_v39 = vld [vmem:[#allocation7 + $0x12c] ss:$28 sps:$4 sm:$0xff]  }
 0x273   :  { %v4137_v41 = vld [vmem:[#allocation7 + $0x2f0] ss:$28 sps:$4 sm:$0xff]  }
 0x275   :  { %2882 = vmatpush1.bf16.msra.mxu0 %v4055_v42  ;;  %2968 = vmatpush1.bf16.msra.mxu1 %v4058_v43  ;;  %v4134_v42 = vld [vmem:[#allocation7 + $0x128] ss:$28 sps:$4 sm:$0xff]   ;;  %v4138_v43 = vld [vmem:[#allocation7 + $0x130] ss:$28 sps:$4 sm:$0xff]  }
 0x276   :  { %2883 = vmatprep.subr.bf16.mxu0 %v4063_v44  ;;  %2969 = vmatprep.subr.bf16.mxu1 %v4066_v45  ;;  %v4141_v44 = vld [vmem:[#allocation7 + $0x164] ss:$28 sps:$4 sm:$0xff]  }
 0x277   :  { %v4142_v45 = vld [vmem:[#allocation7 + $0x328] ss:$28 sps:$4 sm:$0xff]  }
 0x279   :  { %2884 = vmatpush1.bf16.msra.mxu0 %v4061_v46  ;;  %2970 = vmatpush1.bf16.msra.mxu1 %v4064_v47  ;;  %v4139_v46 = vld [vmem:[#allocation7 + $0x160] ss:$28 sps:$4 sm:$0xff]   ;;  %v4143_v47 = vld [vmem:[#allocation7 + $0x168] ss:$28 sps:$4 sm:$0xff]  }
 0x27a   :  { %2885 = vmatprep.subr.bf16.mxu0 %v4069_v48  ;;  %2971 = vmatprep.subr.bf16.mxu1 %v4072_v49  ;;  %v4146_v48 = vld [vmem:[#allocation7 + $0x19c] ss:$28 sps:$4 sm:$0xff]  }
 0x27b   :  { %v4147_v49 = vld [vmem:[#allocation7 + $0x360] ss:$28 sps:$4 sm:$0xff]  }
 0x27d   :  { %2886 = vmatpush1.bf16.msra.mxu0 %v4067_v50  ;;  %2972 = vmatpush1.bf16.msra.mxu1 %v4070_v51  ;;  %v4144_v50 = vld [vmem:[#allocation7 + $0x198] ss:$28 sps:$4 sm:$0xff]   ;;  %v4148_v51 = vld [vmem:[#allocation7 + $0x1a0] ss:$28 sps:$4 sm:$0xff]  }
 0x27e   :  { %2887 = vmatprep.subr.bf16.mxu0 %v4075_v52  ;;  %2973 = vmatprep.subr.bf16.mxu1 %v4078_v53  ;;  %v4151_v52 = vld [vmem:[#allocation7 + $0x1d4] ss:$28 sps:$4 sm:$0xff]  }
 0x27f   :  { %v4152_v53 = vld [vmem:[#allocation7 + $0x558] ss:$28 sps:$4 sm:$0xff]  }
 0x281   :  { %2888 = vmatpush1.bf16.msra.mxu0 %v4073_v54  ;;  %2974 = vmatpush1.bf16.msra.mxu1 %v4076_v55  ;;  %v4149_v54 = vld [vmem:[#allocation7 + $0x1d0] ss:$28 sps:$4 sm:$0xff]   ;;  %v4153_v55 = vld [vmem:[#allocation7 + $0x398] ss:$28 sps:$4 sm:$0xff]  }
 0x282   :  { %2889 = vmatprep.subr.bf16.mxu0 %v4081_v56  ;;  %2975 = vmatprep.subr.bf16.mxu1 %v4084_v57  ;;  %v4156_v56 = vld [vmem:[#allocation7 + $0x20c] ss:$28 sps:$4 sm:$0xff]  }
 0x283   :  { %v4157_v57 = vld [vmem:[#allocation7 + $0x590] ss:$28 sps:$4 sm:$0xff]  }
 0x285   :  { %2890 = vmatpush1.bf16.msra.mxu0 %v4079_v58  ;;  %2976 = vmatpush1.bf16.msra.mxu1 %v4082_v59  ;;  %v4154_v58 = vld [vmem:[#allocation7 + $0x208] ss:$28 sps:$4 sm:$0xff]   ;;  %v4158_v59 = vld [vmem:[#allocation7 + $0x3d0] ss:$28 sps:$4 sm:$0xff]  }
 0x286   :  { %2891 = vmatprep.subr.bf16.mxu0 %v4087_v60  ;;  %2977 = vmatprep.subr.bf16.mxu1 %v4090_v61  ;;  %v4161_v60 = vld [vmem:[#allocation7 + $0x244] ss:$28 sps:$4 sm:$0xff]  }
 0x287   :  { %v4162_v61 = vld [vmem:[#allocation7 + $0x5c8] ss:$28 sps:$4 sm:$0xff]  }
 0x289   :  { %2892 = vmatpush1.bf16.msra.mxu0 %v4085_v62  ;;  %2978 = vmatpush1.bf16.msra.mxu1 %v4088_v63  ;;  %v4159_v62 = vld [vmem:[#allocation7 + $0x240] ss:$28 sps:$4 sm:$0xff]   ;;  %v4163_v63 = vld [vmem:[#allocation7 + $0x408] ss:$28 sps:$4 sm:$0xff]  }
 0x28a   :  { %2893 = vmatprep.subr.bf16.mxu0 %v4093_v0  ;;  %2979 = vmatprep.subr.bf16.mxu1 %v4096_v1  ;;  %v4166_v0 = vld [vmem:[#allocation7 + $0x27c] ss:$28 sps:$4 sm:$0xff]  }
 0x28b   :  { %v4167_v1 = vld [vmem:[#allocation7 + $0x600] ss:$28 sps:$4 sm:$0xff]  }
 0x28d   :  { %2894 = vmatpush1.bf16.msra.mxu0 %v4091_v2  ;;  %2980 = vmatpush1.bf16.msra.mxu1 %v4094_v3  ;;  %v4164_v2 = vld [vmem:[#allocation7 + $0x278] ss:$28 sps:$4 sm:$0xff]   ;;  %v4168_v3 = vld [vmem:[#allocation7 + $0x440] ss:$28 sps:$4 sm:$0xff]  }
 0x28e   :  { %2895 = vmatprep.subr.bf16.mxu0 %v4099_v4  ;;  %2981 = vmatprep.subr.bf16.mxu1 %v4102_v9  ;;  %v4171_v4 = vld [vmem:[#allocation7 + $0x2b4] ss:$28 sps:$4 sm:$0xff]  }
 0x28f   :  { %v4172_v9 = vld [vmem:[#allocation7 + $0x638] ss:$28 sps:$4 sm:$0xff]  }
 0x291   :  { %2896 = vmatpush1.bf16.msra.mxu0 %v4097_v10  ;;  %2982 = vmatpush1.bf16.msra.mxu1 %v4100_v11  ;;  %v4169_v10 = vld [vmem:[#allocation7 + $0x2b0] ss:$28 sps:$4 sm:$0xff]   ;;  %v4173_v11 = vld [vmem:[#allocation7 + $0x478] ss:$28 sps:$4 sm:$0xff]  }
 0x292   :  { %2897 = vmatprep.subr.bf16.mxu0 %v4105_v12  ;;  %2983 = vmatprep.subr.bf16.mxu1 %v4108_v14  ;;  %v4176_v12 = vld [vmem:[#allocation7 + $0x2ec] ss:$28 sps:$4 sm:$0xff]  }
 0x293   :  { %v4177_v14 = vld [vmem:[#allocation7 + $0x670] ss:$28 sps:$4 sm:$0xff]  }
 0x295   :  { %2898 = vmatpush1.bf16.msra.mxu0 %v4103_v15  ;;  %2984 = vmatpush1.bf16.msra.mxu1 %v4106_v17  ;;  %v4174_v15 = vld [vmem:[#allocation7 + $0x2e8] ss:$28 sps:$4 sm:$0xff]   ;;  %v4178_v17 = vld [vmem:[#allocation7 + $0x4b0] ss:$28 sps:$4 sm:$0xff]  }
 0x296   :  { %2996 = vmatprep.subr.bf16.mxu0 %v4111_v18  ;;  %3581 = vmatprep.subr.bf16.mxu1 %v4112_v19  ;;  %v4181_v18 = vld [vmem:[#allocation7 + $0x324] ss:$28 sps:$4 sm:$0xff]  }
 0x297   :  { %v4182_v19 = vld [vmem:[#allocation7 + $0x6a8] ss:$28 sps:$4 sm:$0xff]  }
 0x298   :  { %2900 = vmatmul.mubr.bf16.vlgmr.msra.gmra.mrb[4].mxu0 %v4472_v6  ;;  %2986 = vmatmul.mubr.bf16.vlgmr.msra.gmra.mrb[12].mxu1 %v4472_v6 }
 0x299   :  { %2997 = vmatpush1.bf16.msra.mxu0 %v4109_v20  ;;  %3028 = vmatprep.mubr.bf16.mxu0 %v4474_v7  ;;  %v4179_v20 = vld [vmem:[#allocation7 + $0x320] ss:$28 sps:$4 sm:$0xff]  }
 0x29a   :  { %3582 = vmatpush3.bf16.msra.mxu1 %v4113_v21  ;;  %3114 = vmatprep.mubr.bf16.mxu1 %v4474_v7  ;;  %v4132_v7 = vld [vmem:[#allocation7 + $0x2b8] ss:$28 sps:$4 sm:$0xff]   ;;  %v4183_v21 = vld [vmem:[#allocation7 + $0x4e8] ss:$28 sps:$4 sm:$0xff]  }
 0x29b   :  { %2998 = vmatprep.subr.bf16.mxu0 %v4116_v22  ;;  %3583 = vmatprep.subr.bf16.mxu1 %v4117_v23  ;;  %v4186_v22 = vld [vmem:[#allocation7 + $0x35c] ss:$28 sps:$4 sm:$0xff]  }
 0x29c   :  { %v4187_v23 = vld [vmem:[#allocation7 + $0x6e0] ss:$28 sps:$4 sm:$0xff]  }
 0x29d   :  { %2999 = vmatpush1.bf16.msra.mxu0 %v4114_v24  ;;  %v4184_v24 = vld [vmem:[#allocation7 + $0x358] ss:$28 sps:$4 sm:$0xff]  }
 0x29e   :  { %3584 = vmatpush3.bf16.msra.mxu1 %v4118_v25  ;;  %3000 = vmatprep.subr.bf16.mxu0 %v4121_v26  ;;  %v4188_v25 = vld [vmem:[#allocation7 + $0x520] ss:$28 sps:$4 sm:$0xff]   ;;  %v4191_v26 = vld [vmem:[#allocation7 + $0x394] ss:$28 sps:$4 sm:$0xff]  }
 0x29f   :  { %3585 = vmatprep.subr.bf16.mxu1 %v4122_v27  ;;  %v4189_v27 = vld [vmem:[#allocation7 + $0x390] ss:$28 sps:$4 sm:$0xff]  }
 0x2a1   :  { %3001 = vmatpush1.bf16.msra.mxu0 %v4119_v28  ;;  %v4194_v28 = vld [vmem:[#allocation7 + $0x3cc] ss:$28 sps:$4 sm:$0xff]  }
 0x2a2   :  { %3586 = vmatpush3.bf16.msra.mxu1 %v4123_v29  ;;  %3002 = vmatprep.subr.bf16.mxu0 %v4126_v30  ;;  %v4192_v29 = vld [vmem:[#allocation7 + $0x3c8] ss:$28 sps:$4 sm:$0xff]  }
 0x2a3   :  { %3587 = vmatprep.subr.bf16.mxu1 %v4127_v31  ;;  %v4197_v30 = vld [vmem:[#allocation7 + $0x404] ss:$28 sps:$4 sm:$0xff]  }
 0x2a4   :  { %v4195_v31 = vld [vmem:[#allocation7 + $0x400] ss:$28 sps:$4 sm:$0xff]  }
 0x2a5   :  { %3003 = vmatpush1.bf16.msra.mxu0 %v4124_v32  ;;  %v4200_v32 = vld [vmem:[#allocation7 + $0x43c] ss:$28 sps:$4 sm:$0xff]  }
 0x2a6   :  { %3588 = vmatpush3.bf16.msra.mxu1 %v4128_v33  ;;  %3004 = vmatprep.subr.bf16.mxu0 %v4131_v34  ;;  %v4198_v33 = vld [vmem:[#allocation7 + $0x438] ss:$28 sps:$4 sm:$0xff]  }
 0x2a7   :  { %3589 = vmatprep.subr.bf16.mxu1 %v4132_v7  ;;  %v4203_v34 = vld [vmem:[#allocation7 + $0x474] ss:$28 sps:$4 sm:$0xff]  }
 0x2a8   :  { %v4201_v7 = vld [vmem:[#allocation7 + $0x470] ss:$28 sps:$4 sm:$0xff]  }
 0x2a9   :  { %3005 = vmatpush1.bf16.msra.mxu0 %v4129_v35  ;;  %v4204_v35 = vld [vmem:[#allocation7 + $0x4a8] ss:$28 sps:$4 sm:$0xff]  }
 0x2aa   :  { %3590 = vmatpush3.bf16.msra.mxu1 %v4133_v36  ;;  %3006 = vmatprep.subr.bf16.mxu0 %v4136_v39  ;;  %v4209_v36 = vld [vmem:[#allocation7 + $0x4e4] ss:$28 sps:$4 sm:$0xff]   ;;  %v4212_v39 = vld [vmem:[#allocation7 + $0x51c] ss:$28 sps:$4 sm:$0xff]  }
 0x2ab   :  { %3591 = vmatprep.subr.bf16.mxu1 %v4137_v41  ;;  %v4210_v41 = vld [vmem:[#allocation7 + $0x518] ss:$28 sps:$4 sm:$0xff]  }
 0x2ad   :  { %3007 = vmatpush1.bf16.msra.mxu0 %v4134_v42  ;;  %v4215_v42 = vld [vmem:[#allocation7 + $0x554] ss:$28 sps:$4 sm:$0xff]  }
 0x2ae   :  { %3592 = vmatpush3.bf16.msra.mxu1 %v4138_v43  ;;  %3008 = vmatprep.subr.bf16.mxu0 %v4141_v44  ;;  %v4213_v43 = vld [vmem:[#allocation7 + $0x550] ss:$28 sps:$4 sm:$0xff]  }
 0x2af   :  { %3593 = vmatprep.subr.bf16.mxu1 %v4142_v45  ;;  %v4218_v44 = vld [vmem:[#allocation7 + $0x58c] ss:$28 sps:$4 sm:$0xff]  }
 0x2b0   :  { %v4216_v45 = vld [vmem:[#allocation7 + $0x588] ss:$28 sps:$4 sm:$0xff]  }
 0x2b1   :  { %3009 = vmatpush1.bf16.msra.mxu0 %v4139_v46  ;;  %v4221_v46 = vld [vmem:[#allocation7 + $0x5c4] ss:$28 sps:$4 sm:$0xff]  }
 0x2b2   :  { %3594 = vmatpush3.bf16.msra.mxu1 %v4143_v47  ;;  %3010 = vmatprep.subr.bf16.mxu0 %v4146_v48  ;;  %v4219_v47 = vld [vmem:[#allocation7 + $0x5c0] ss:$28 sps:$4 sm:$0xff]  }
 0x2b3   :  { %3595 = vmatprep.subr.bf16.mxu1 %v4147_v49  ;;  %v4224_v48 = vld [vmem:[#allocation7 + $0x5fc] ss:$28 sps:$4 sm:$0xff]  }
 0x2b4   :  { %v4222_v49 = vld [vmem:[#allocation7 + $0x5f8] ss:$28 sps:$4 sm:$0xff]  }
 0x2b5   :  { %3011 = vmatpush1.bf16.msra.mxu0 %v4144_v50  ;;  %v4227_v50 = vld [vmem:[#allocation7 + $0x634] ss:$28 sps:$4 sm:$0xff]  }
 0x2b6   :  { %3596 = vmatpush3.bf16.msra.mxu1 %v4148_v51  ;;  %3012 = vmatprep.subr.bf16.mxu0 %v4151_v52  ;;  %v4225_v51 = vld [vmem:[#allocation7 + $0x630] ss:$28 sps:$4 sm:$0xff]  }
 0x2b7   :  { %3603 = vmatprep.subr.bf16.mxu1 %v4152_v53  ;;  %v4230_v52 = vld [vmem:[#allocation7 + $0x66c] ss:$28 sps:$4 sm:$0xff]  }
 0x2b8   :  { %v4228_v53 = vld [vmem:[#allocation7 + $0x668] ss:$28 sps:$4 sm:$0xff]  }
 0x2b9   :  { %3115 = vmatmul.mubr.bf16.vlgmr.msra.gmra.mrb[16].mxu1 %v4470_v5  ;;  %3013 = vmatpush1.bf16.msra.mxu0 %v4149_v54  ;;  %v4233_v54 = vld [vmem:[#allocation7 + $0x6a4] ss:$28 sps:$4 sm:$0xff]  }
 0x2ba   :  { %3604 = vmatpush3.bf16.msra.mxu1 %v4153_v55  ;;  %3155 = vmatprep.mubr.bf16.mxu1 %v4476_v8  ;;  %v4231_v55 = vld [vmem:[#allocation7 + $0x6a0] ss:$28 sps:$4 sm:$0xff]  }
 0x2bb   :  { %3014 = vmatprep.subr.bf16.mxu0 %v4156_v56  ;;  %3605 = vmatprep.subr.bf16.mxu1 %v4157_v57  ;;  %v4236_v56 = vld [vmem:[#allocation7 + $0x6dc] ss:$28 sps:$4 sm:$0xff]  }
 0x2bc   :  { %v4234_v57 = vld [vmem:[#allocation7 + $0x6d8] ss:$28 sps:$4 sm:$0xff]  }
 0x2bd   :  { %3015 = vmatpush1.bf16.msra.mxu0 %v4154_v58  ;;  %v1635_v58 = vld [vmem:[%s4522_s6] sm:$0xff]  ;;  %s4339_s6 = smov [#allocation8]  }
 0x2be   :  { %3606 = vmatpush3.bf16.msra.mxu1 %v4158_v59  ;;  %3016 = vmatprep.subr.bf16.mxu0 %v4161_v60  ;;  %v1640_v59 = vrot.slane %v1635_v58, %v4435_v38  ;;  %v1648_v60 = vrot.slane %v1635_v58, %v4450_v13  ;;  %s3183_s20 = sshll.u32 %s4339_s6, 4  ;;  %s3184_s20 = int_to_ptr.vmem [resolvable:$true] %s3183_s20 }
 0x2bf   :  { %3607 = vmatprep.subr.bf16.mxu1 %v4162_v61  ;;  %v1644_v61 = vrot.slane %v1635_v58, %v4443_v40  ;;  %s4303_s21 = scalar_lea.vmem %s3184_s20, 1792  ;;  %p4308_p11 = scmp.lt.s32.totalorder %s3184_s20, %s3184_s20 }
 0x2c0   :  { %p4304_p10 = scmp.ne.s32.totalorder %s3184_s20, %s4303_s21  ;;  %p4309_p12 = scmp.lt.s32.totalorder %s4303_s21, %s4303_s21 }
 0x2c1   :  { %3017 = vmatpush1.bf16.msra.mxu0 %v4159_v62  ;;  %v1652_v62 = vrot.slane %v1635_v58, %v4453_v16 }
 0x2c2   :  { %3608 = vmatpush3.bf16.msra.mxu1 %v4163_v63  ;;  %3018 = vmatprep.subr.bf16.mxu0 %v4166_v0  ;;  %p4310_p13 = por %p4309_p12, %p4308_p11 }
 0x2c3   :  { %3609 = vmatprep.subr.bf16.mxu1 %v4167_v1 }
 0x2c4   :  { %p4311_p0 = pnand %p4310_p13, %p4304_p10 }
 0x2c5   :  { %3019 = vmatpush1.bf16.msra.mxu0 %v4164_v2 }
 0x2c6   :  { %3610 = vmatpush3.bf16.msra.mxu1 %v4168_v3  ;;  %3020 = vmatprep.subr.bf16.mxu0 %v4171_v4 }
 0x2c7   :  { %3611 = vmatprep.subr.bf16.mxu1 %v4172_v9 }
 0x2c9   :  { %3021 = vmatpush1.bf16.msra.mxu0 %v4169_v10 }
 0x2ca   :  { %3612 = vmatpush3.bf16.msra.mxu1 %v4173_v11  ;;  %3022 = vmatprep.subr.bf16.mxu0 %v4176_v12 }
 0x2cb   :  { %3613 = vmatprep.subr.bf16.mxu1 %v4177_v14 }
 0x2cd   :  { %3023 = vmatpush1.bf16.msra.mxu0 %v4174_v15 }
 0x2ce   :  { %3614 = vmatpush3.bf16.msra.mxu1 %v4178_v17  ;;  %3024 = vmatprep.subr.bf16.mxu0 %v4181_v18 }
 0x2cf   :  { %3615 = vmatprep.subr.bf16.mxu1 %v4182_v19 }
 0x2d1   :  { %3025 = vmatpush1.bf16.msra.mxu0 %v4179_v20 }
 0x2d2   :  { %3616 = vmatpush3.bf16.msra.mxu1 %v4183_v21  ;;  %3026 = vmatprep.subr.bf16.mxu0 %v4186_v22  ;;  %v1663_v22 = vsub.s32 6, %v4432_v37 }
 0x2d3   :  { %3617 = vmatprep.subr.bf16.mxu1 %v4187_v23 }
 0x2d4   :  { %v1664_v23 = vrot.slane %v1635_v58, %v1663_v22 }
 0x2d5   :  { %3027 = vmatpush1.bf16.msra.mxu0 %v4184_v24 }
 0x2d6   :  { %3618 = vmatpush3.bf16.msra.mxu1 %v4188_v25  ;;  %3039 = vmatprep.subr.bf16.mxu0 %v4191_v26 }
 0x2d8   :  { %3029 = vmatmul.mubr.bf16.vlgmr.msra.gmra.mrb[8].mxu0 %v4470_v5  ;;  %v4206_v5 = vld [vmem:[#allocation7 + $0x4ac] ss:$28 sps:$4 sm:$0xff]  }
 0x2d9   :  { %3156 = vmatmul.mubr.bf16.vlgmr.msra.gmra.mrb[20].mxu1 %v4472_v6  ;;  %3040 = vmatpush1.bf16.msra.mxu0 %v4189_v27 }
 0x2da   :  { %3071 = vmatprep.mubr.bf16.mxu0 %v4476_v8  ;;  %3041 = vmatprep.subr.bf16.mxu0 %v4194_v28  ;;  %v4207_v8 = vld [vmem:[#allocation7 + $0x4e0] ss:$28 sps:$4 sm:$0xff]  }
 0x2dd   :  { %3042 = vmatpush1.bf16.msra.mxu0 %v4192_v29 }
 0x2de   :  { %3043 = vmatprep.subr.bf16.mxu0 %v4197_v30 }
 0x2e1   :  { %3044 = vmatpush1.bf16.msra.mxu0 %v4195_v31 }
 0x2e2   :  { %3045 = vmatprep.subr.bf16.mxu0 %v4200_v32 }
 0x2e5   :  { %3046 = vmatpush1.bf16.msra.mxu0 %v4198_v33 }
 0x2e6   :  { %3047 = vmatprep.subr.bf16.mxu0 %v4203_v34  ;;  %v1655_v34 = vsub.s32 4, %v4432_v37 }
 0x2e9   :  { %3048 = vmatpush1.bf16.msra.mxu0 %v4201_v7  ;;  %v1659_v7 = vsub.s32 5, %v4432_v37 }
 0x2ea   :  { %3049 = vmatprep.subr.bf16.mxu0 %v4206_v5  ;;  %v1656_v5 = vrot.slane %v1635_v58, %v1655_v34 }
 0x2ed   :  { %3050 = vmatpush1.bf16.msra.mxu0 %v4204_v35  ;;  %v1660_v35 = vrot.slane %v1635_v58, %v1659_v7 }
 0x2ee   :  { %3051 = vmatprep.subr.bf16.mxu0 %v4209_v36 }
 0x2f1   :  { %3052 = vmatpush1.bf16.msra.mxu0 %v4207_v8 }
 0x2f2   :  { %3053 = vmatprep.subr.bf16.mxu0 %v4212_v39 }
 0x2f5   :  { %3054 = vmatpush1.bf16.msra.mxu0 %v4210_v41 }
 0x2f6   :  { %3055 = vmatprep.subr.bf16.mxu0 %v4215_v42 }
 0x2f9   :  { %3056 = vmatpush1.bf16.msra.mxu0 %v4213_v43 }
 0x2fa   :  { %3057 = vmatprep.subr.bf16.mxu0 %v4218_v44 }
 0x2fd   :  { %3058 = vmatpush1.bf16.msra.mxu0 %v4216_v45 }
 0x2fe   :  { %3059 = vmatprep.subr.bf16.mxu0 %v4221_v46 }
 0x301   :  { %3060 = vmatpush1.bf16.msra.mxu0 %v4219_v47 }
 0x302   :  { %3061 = vmatprep.subr.bf16.mxu0 %v4224_v48 }
 0x305   :  { %3062 = vmatpush1.bf16.msra.mxu0 %v4222_v49 }
 0x306   :  { %3063 = vmatprep.subr.bf16.mxu0 %v4227_v50 }
 0x309   :  { %3064 = vmatpush1.bf16.msra.mxu0 %v4225_v51 }
 0x30a   :  { %3065 = vmatprep.subr.bf16.mxu0 %v4230_v52 }
 0x30d   :  { %3066 = vmatpush1.bf16.msra.mxu0 %v4228_v53 }
 0x30e   :  { %3067 = vmatprep.subr.bf16.mxu0 %v4233_v54 }
 0x311   :  { %3068 = vmatpush1.bf16.msra.mxu0 %v4231_v55 }
 0x312   :  { %3069 = vmatprep.subr.bf16.mxu0 %v4236_v56 }
 0x315   :  { %3070 = vmatpush1.bf16.msra.mxu0 %v4234_v57 }
 0x318   :  { %3072 = vmatmul.mubr.bf16.vlgmr.msra.gmra.mrb[8].mxu0 %v4472_v6 }
 0x36b   :  { %v2901_v63 = vpop.f32.mrb[4].mxu0  ;;  %v2987_v0 = vpop.f32.mrb[12].mxu1 }
 0x36c   :  { %v3633_v1 = vadd.f32 %v2901_v63, %v1640_v59  ;;  %v3637_v2 = vadd.f32 %v2987_v0, %v1648_v60  ;;  %v2903_v3 = vpop.f32.mrb[5].mxu0  ;;  %v2989_v4 = vpop.f32.mrb[13].mxu1 }
 0x36d   :  { %v3634_v9 = vadd.f32 %v2903_v3, %v1644_v61  ;;  %v3638_v6 = vadd.f32 %v2989_v4, %v1652_v62  ;;  %v2905_v10 = vpop.f32.mrb[6].mxu0  ;;  %v2991_v11 = vpop.f32.mrb[14].mxu1 }
 0x36e   :  { %3164 = vst [vmem:[#allocation8] sm:$0xff] %v3633_v1  ;;  %3166 = vst [vmem:[#allocation8 + $0x10] sm:$0xff] %v3637_v2  ;;  %v3635_v12 = vadd.f32 %v2905_v10, %v1640_v59  ;;  %v3639_v38 = vadd.f32 %v2991_v11, %v1648_v60  ;;  %v2907_v14 = vpop.f32.mrb[7].mxu0  ;;  %v2993_v13 = vpop.f32.mrb[15].mxu1 }
 0x36f   :  { %3165 = vst [vmem:[#allocation8 + $0x8] sm:$0xff] %v3634_v9  ;;  %3167 = vst [vmem:[#allocation8 + $0x18] sm:$0xff] %v3638_v6  ;;  %v3636_v40 = vadd.f32 %v2907_v14, %v1644_v61  ;;  %v3640_v16 = vadd.f32 %v2993_v13, %v1652_v62 }
 0x370   :  { %3171 = vst [vmem:[#allocation8 + $0x38] sm:$0xff] %v3635_v12  ;;  %3173 = vst [vmem:[#allocation8 + $0x48] sm:$0xff] %v3639_v38 }
 0x371   :  { %3172 = vst [vmem:[#allocation8 + $0x40] sm:$0xff] %v3636_v40  ;;  %3174 = vst [vmem:[#allocation8 + $0x50] sm:$0xff] %v3640_v16 }
 0x38c   :  { %v3597_v15 = vpop.f32.mrb[16].mxu1 }
 0x38d   :  { %v3598_v17 = vpop.f32.mrb[17].mxu1 }
 0x38e   :  { %v3599_v18 = vadd.f32 %v3598_v17, %v3597_v15  ;;  %v3600_v19 = vpop.f32.mrb[18].mxu1 }
 0x38f   :  { %v3601_v20 = vpop.f32.mrb[19].mxu1 }
 0x390   :  { %v3602_v21 = vadd.f32 %v3601_v20, %v3600_v19  ;;  %v3117_v26 = vadd.f32 %v3599_v18, %v1664_v23 }
 0x392   :  { %v3120_v30 = vadd.f32 %v3602_v21, %v1664_v23 }
 0x3ac   :  { %v3619_v24 = vpop.f32.mrb[20].mxu1 }
 0x3ad   :  { %v3620_v25 = vpop.f32.mrb[21].mxu1 }
 0x3ae   :  { %v3621_v27 = vadd.f32 %v3620_v25, %v3619_v24  ;;  %v3622_v28 = vpop.f32.mrb[22].mxu1 }
 0x3af   :  { %v3623_v29 = vpop.f32.mrb[23].mxu1 }
 0x3b0   :  { %v3158_v31 = vadd.f32 %v3621_v27, %v3117_v26  ;;  %v3624_v32 = vadd.f32 %v3623_v29, %v3622_v28 }
 0x3b2   :  { %3170 = vst [vmem:[#allocation8 + $0x30] sm:$0xff] %v3158_v31  ;;  %v3161_v33 = vadd.f32 %v3624_v32, %v3120_v30 }
 0x3b4   :  { %3177 = vst [vmem:[#allocation8 + $0x68] sm:$0xff] %v3161_v33 }
 0x3eb   :  { %v3073_v36 = vpop.f32.mrb[8].mxu0 }
 0x3ec   :  { %v3641_v8 = vadd.f32 %v3073_v36, %v1656_v5  ;;  %v3075_v39 = vpop.f32.mrb[9].mxu0 }
 0x3ed   :  { %v3642_v41 = vadd.f32 %v3075_v39, %v1660_v35  ;;  %v3077_v42 = vpop.f32.mrb[10].mxu0 }
 0x3ee   :  { %3168 = vst [vmem:[#allocation8 + $0x20] sm:$0xff] %v3641_v8  ;;  %v3643_v43 = vadd.f32 %v3077_v42, %v1656_v5  ;;  %v3079_v44 = vpop.f32.mrb[11].mxu0 }
 0x3ef   :  { %3169 = vst [vmem:[#allocation8 + $0x28] sm:$0xff] %v3642_v41  ;;  %v3644_v45 = vadd.f32 %v3079_v44, %v1660_v35 }
 0x3f0   :  { %3175 = vst [vmem:[#allocation8 + $0x58] sm:$0xff] %v3643_v43 }
 0x3f1   :  { %3176 = vst [vmem:[#allocation8 + $0x60] sm:$0xff] %v3644_v45 }
 0x3f2   :  { %4314 = shalt.err (!%p4311_p0)
}
 0x3f3   :  { %s4315_s24 = scalar_lea.hbm %s4523_s7, 1792 }
 0x3f4   :  { %p4316_p1 = scmp.ne.s32.totalorder %s4523_s7, %s4315_s24  ;;  %p4319_p2 = scmp.lt.u32.totalorder %s4315_s24, %s4523_s7 }
 0x3f6   :  { %p4321_p3 = pnand %p4319_p2, %p4316_p1 }
 0x3f8   :  { %4324 = shalt.err (!%p4321_p3)
}
 0x3f9   :  { %s4340_s29 = smov 896   ;;  %s4341_s30 = smov 56  }
 0x3fa   :  { %3189 = dma.vmem_to_hbm [thread:$0]  %s3184_s20, 1792, %s4523_s7, [#allocation4], %s4340_s29, %s4340_s29, %s4341_s30  }
 0x3fb   :  { %4329 = dma.done.wait [#allocation4], 1792  }
 0x3fc   :  { %4330 = vsyncadd [#allocation4], 4294965504 }
 0x3fd   :  { %3193 = vsyncpa [#allocation3], 1 }
 0x3fe   :  { %3194 = vsyncpa [#allocation6], 1 }
 0x3ff   :  { %3195 = vsyncpa [#allocation4], 1 }

</bundles_post_ra>
